<compile_context>
chip_gen: v5e
topology: v5e:2x2
jax: 0.10.0
libtpu: 0.0.40
codegen_flags: <defaults>
</compile_context>

<pallas_src>
import functools

import jax
import jax.numpy as jnp
import numpy as np
from jax import lax
from jax.experimental import pallas as pl
from jax.experimental.pallas import tpu as pltpu


# ----------------------------- config -------------------------------------
class Config:
    batch_size = 2
    max_n_days = 2
    max_n_msgs = 2
    max_n_words = 8          # T
    word_embed_size = 16     # E
    mel_h_size = 16          # H
    use_in_bn = False        # BN branch disabled (synthetic config)
    dropout_mel_in = 0.1     # dropout is identity in eval mode


# ----------------------------- Pallas kernel -------------------------------
def gru_fwd_select_kernel(x_ref, ss_ref, nw_ref,
                          wihT_ref, whhT_ref, bx_ref, bhn_ref,
                          o_ref):
    """Forward-direction GRU over T steps, batch-on-lanes layout.

    x_ref   : (T, E, bn)  time-major inputs, batch on the lane axis
    ss_ref  : (1, bn) int32  position to select per sequence
    nw_ref  : (1, bn) int32  sequence lengths
    wihT_ref: (3H, E)  fused input->gate weights (transposed), gate order [r | z | n]
    whhT_ref: (3H, H)  fused hidden->gate weights (transposed), gate order [r | z | n]
    bx_ref  : (3H, 1)  pre-folded biases: [b_ir+b_hr | b_iz+b_hz | b_in]
    bhn_ref : (H, 1)   b_hn (must stay inside r * (...))
    o_ref   : (H, bn)  selected hidden state (forward direction), lane-dense store
    """
    T, E, bn = x_ref.shape
    H = o_ref.shape[0]
    H2, H3 = 2 * H, 3 * H

    w_ihT = wihT_ref[...]                     # (3H, E)
    w_hhT = whhT_ref[...]                     # (3H, H)
    ss = ss_ref[...]                          # (1, bn) int32
    nw = nw_ref[...]                          # (1, bn) int32

    # Hoisted lane-broadcasts of the biases (done once, not per step).
    b_x = jnp.broadcast_to(bx_ref[...], (H3, bn))     # (3H, bn) f32
    b_hn = jnp.broadcast_to(bhn_ref[...], (H, bn))    # (H, bn)  f32

    # Hoisted input projection, t-leading so gx[t] is a free leading-index view.
    # These T dots do not depend on h, so the scheduler overlaps them with the recurrence.
    gx = [jnp.dot(w_ihT, x_ref[t], preferred_element_type=jnp.float32) + b_x
          for t in range(T)]                          # each (3H, bn) f32

    h = jnp.zeros((H, bn), jnp.float32)
    out = jnp.zeros((H, bn), jnp.float32)

    # Fully unrolled recurrence (T small & static): one fused MXU dot per step.
    for t in range(T):
        gh = jnp.dot(w_hhT, h.astype(w_hhT.dtype),
                     preferred_element_type=jnp.float32)          # (3H, bn)
        g = gx[t]
        rz = jax.nn.sigmoid(g[0:H2, :] + gh[0:H2, :])             # fused r|z sigmoid (one EUP slab)
        r = rz[0:H, :]
        z = rz[H:H2, :]
        n = jnp.tanh(g[H2:H3, :] + r * (gh[H2:H3, :] + b_hn))
        h = (1.0 - z) * n + z * h
        out = jnp.where(ss == t, h, out)              # keep hidden state at t == ss_index

    # pad_packed_sequence zero-pads positions >= max(length, 1),
    # so selections past the effective length read zeros.
    valid = ss < jnp.maximum(nw, 1)
    o_ref[...] = jnp.where(valid, out, 0.0).astype(o_ref.dtype)


# ----------------------------- wrapper -------------------------------------
def msg_encoder_forward(x, n_words, ss_index, params, config, *,
                        block_rows=1024, use_bf16=True):
    B, D, M = config.batch_size, config.max_n_days, config.max_n_msgs
    T, E, H = config.max_n_words, config.word_embed_size, config.mel_h_size
    N = B * D * M
    LANE = 128

    # use_in_bn=False -> no BN; dropout in eval mode -> identity.
    x3 = x.reshape(N, T, E)
    ss = ss_index.reshape(N).astype(jnp.int32)
    nw = n_words.reshape(N).astype(jnp.int32)

    # ---- fuse / pre-fold parameters, transposed for batch-on-lanes (tiny, trace-time) ----
    w_ih = params["w_ih"]                                  # (3, E, H), gate order (r, z, n)
    w_hh = params["w_hh"]                                  # (3, H, H)
    b_ih = params["b_ih"].reshape(3, H)
    b_hh = params["b_hh"].reshape(3, H)
    w_ihT = jnp.concatenate([w_ih[0].T, w_ih[1].T, w_ih[2].T], axis=0)   # (3H, E)
    w_hhT = jnp.concatenate([w_hh[0].T, w_hh[1].T, w_hh[2].T], axis=0)   # (3H, H)
    b_x = jnp.concatenate([b_ih[0] + b_hh[0],                            # r
                           b_ih[1] + b_hh[1],                            # z
                           b_ih[2]], axis=0).reshape(3 * H, 1)           # n (x-side only)
    b_x = b_x.astype(jnp.float32)
    b_hn = b_hh[2].reshape(H, 1).astype(jnp.float32)

    # bf16 matmul operands / f32 accumulation (MXU-native on v5e/v6e/v7x).
    mm_dtype = jnp.bfloat16 if use_bf16 else jnp.float32
    w_ihT = w_ihT.astype(mm_dtype)
    w_hhT = w_hhT.astype(mm_dtype)

    # ---- row blocking on the lane axis: bn multiple of 128; keep >= 2 grid steps (v7x) ----
    n_tiles = -(-N // LANE)
    tiles_per_block = max(1, block_rows // LANE)
    if n_tiles >= 2:
        tiles_per_block = min(tiles_per_block, -(-n_tiles // 2))   # at least 2 grid steps
    tiles_per_block = min(tiles_per_block, n_tiles)
    bn = tiles_per_block * LANE
    n_blocks = -(-n_tiles // tiles_per_block)
    N_pad = n_blocks * bn

    # Time-major, batch-on-lanes x: (T, E, N_pad); ss/nw as (1, N_pad).
    xk = x3.astype(mm_dtype)
    xk = jnp.pad(xk, ((0, N_pad - N), (0, 0), (0, 0)))
    xk = jnp.transpose(xk, (1, 2, 0))                     # one-time HBM rearrangement
    ss2 = jnp.pad(ss, (0, N_pad - N)).reshape(1, N_pad)
    nw2 = jnp.pad(nw, (0, N_pad - N)).reshape(1, N_pad)

    # Explicit VMEM budget (double-buffered blocks + f32 gate intermediates), clamped for v7x.
    x_bytes = 2 if use_bf16 else 4
    vmem_bytes = 4 * (2 * T * E * bn * x_bytes            # double-buffered x blocks
                      + 2 * H * bn * 4                    # double-buffered output blocks
                      + (T + 6) * 3 * H * bn * 4)         # gx list + per-step gate temps
    vmem_bytes = int(min(max(vmem_bytes, 16 << 20), 40 << 20))

    out = pl.pallas_call(
        gru_fwd_select_kernel,
        out_shape=jax.ShapeDtypeStruct((H, N_pad), jnp.float32),
        grid_spec=pltpu.PrefetchScalarGridSpec(
            num_scalar_prefetch=0,
            grid=(n_blocks,),
            in_specs=[
                pl.BlockSpec((T, E, bn), lambda i: (0, 0, i)),     # x (time-major, lane batch)
                pl.BlockSpec((1, bn), lambda i: (0, i)),           # ss_index
                pl.BlockSpec((1, bn), lambda i: (0, i)),           # n_words
                pl.BlockSpec((3 * H, E), lambda i: (0, 0)),        # fused w_ih^T
                pl.BlockSpec((3 * H, H), lambda i: (0, 0)),        # fused w_hh^T
                pl.BlockSpec((3 * H, 1), lambda i: (0, 0)),        # folded x-side biases
                pl.BlockSpec((H, 1), lambda i: (0, 0)),            # b_hn
            ],
            out_specs=pl.BlockSpec((H, bn), lambda i: (0, i)),     # lane-dense output block
        ),
        compiler_params=pltpu.CompilerParams(
            dimension_semantics=("parallel",),                     # shards across TCs on v7x
            vmem_limit_bytes=vmem_bytes),
    )(xk, ss2, nw2, w_ihT, w_hhT, b_x, b_hn)

    # keep the [:N] slice: padded rows carry garbage by construction.
    return out[:, :N].T.reshape(B, D, M, H)


# ----------------------------- pure-JAX reference ---------------------------
def msg_encoder_reference(x, n_words, ss_index, params, config):
    B, D, M = config.batch_size, config.max_n_days, config.max_n_msgs
    T, E, H = config.max_n_words, config.word_embed_size, config.mel_h_size
    N = B * D * M
    x3 = x.reshape(N, T, E).astype(jnp.float32)
    ss = ss_index.reshape(N).astype(jnp.int32)
    nw = n_words.reshape(N).astype(jnp.int32)
    w_ih, w_hh = params["w_ih"], params["w_hh"]
    b_ih, b_hh = params["b_ih"], params["b_hh"]

    def step(h, x_t):
        r = jax.nn.sigmoid(x_t @ w_ih[0] + b_ih[0] + h @ w_hh[0] + b_hh[0])
        z = jax.nn.sigmoid(x_t @ w_ih[1] + b_ih[1] + h @ w_hh[1] + b_hh[1])
        n = jnp.tanh(x_t @ w_ih[2] + b_ih[2] + r * (h @ w_hh[2] + b_hh[2]))
        h_new = (1.0 - z) * n + z * h
        return h_new, h_new

    h0 = jnp.zeros((N, H), jnp.float32)
    _, hs = lax.scan(step, h0, jnp.transpose(x3, (1, 0, 2)))   # (T, N, H)
    hs = jnp.transpose(hs, (1, 0, 2))                          # (N, T, H)
    sel = jnp.take_along_axis(hs, ss[:, None, None], axis=1)[:, 0, :]
    valid = (ss < jnp.maximum(nw, 1))[:, None]
    sel = jnp.where(valid, sel, 0.0)
    return ((sel + sel) * 0.5).reshape(B, D, M, H)


# ----------------------------- main ----------------------------------------
def make_params(key, config):
    E, H = config.word_embed_size, config.mel_h_size
    k = 1.0 / np.sqrt(H)
    k1, k2, k3, k4 = jax.random.split(key, 4)
    return {
        "w_ih": jax.random.uniform(k1, (3, E, H), jnp.float32, -k, k),
        "w_hh": jax.random.uniform(k2, (3, H, H), jnp.float32, -k, k),
        "b_ih": jax.random.uniform(k3, (3, 1, H), jnp.float32, -k, k),
        "b_hh": jax.random.uniform(k4, (3, 1, H), jnp.float32, -k, k),
    }


if __name__ == "__main__":
    cfg = Config()
    key = jax.random.PRNGKey(0)
    kp, kx, kn, ks = jax.random.split(key, 4)

    params = make_params(kp, cfg)

    B, D, M = cfg.batch_size, cfg.max_n_days, cfg.max_n_msgs
    T, E = cfg.max_n_words, cfg.word_embed_size

    x = jax.random.normal(kx, (B, D, M, T, E), jnp.float32)
    n_words = jax.random.randint(kn, (B, D, M), 1, T + 1, jnp.int32)
    # ss_index within the valid range of each sequence
    ss_index = jax.random.randint(ks, (B, D, M), 0, T, jnp.int32) % n_words

    fwd_bf16 = jax.jit(functools.partial(msg_encoder_forward, config=cfg))          # default bf16
    fwd_f32 = jax.jit(functools.partial(msg_encoder_forward, config=cfg, use_bf16=False))

    out_bf16 = jax.block_until_ready(fwd_bf16(x, n_words, ss_index, params))
    out_f32 = jax.block_until_ready(fwd_f32(x, n_words, ss_index, params))

    ref = msg_encoder_reference(x, n_words, ss_index, params, cfg)

    # exact-math (f32) path: tight check of the algorithm
    np.testing.assert_allclose(np.asarray(out_f32), np.asarray(ref), rtol=1e-2, atol=1e-2)
    # bf16-operand default path: looser tolerance for bf16 rounding through the recurrence
    np.testing.assert_allclose(np.asarray(out_bf16), np.asarray(ref), rtol=5e-2, atol=5e-2)

    assert out_bf16.shape == (B, D, M, cfg.mel_h_size)
    print("KERNEL_OK")
</pallas_src>

<mosaic_0001>
module attributes {stable_mosaic.version = 11 : i64} {
  func.func @gru_fwd_select_kernel(%arg0: i32, %arg1: memref<8x16x128xbf16, #tpu.memory_space<vmem>>, %arg2: memref<1x128xi32, #tpu.memory_space<vmem>>, %arg3: memref<1x128xi32, #tpu.memory_space<vmem>>, %arg4: memref<48x16xbf16, #tpu.memory_space<vmem>>, %arg5: memref<48x16xbf16, #tpu.memory_space<vmem>>, %arg6: memref<48x1xf32, #tpu.memory_space<vmem>>, %arg7: memref<16x1xf32, #tpu.memory_space<vmem>>, %arg8: memref<16x128xf32, #tpu.memory_space<vmem>>) attributes {dimension_semantics = [#tpu.dimension_semantics<parallel>], iteration_bounds = array<i64: 1>, scalar_prefetch = 0 : i64, scratch_operands = 0 : i64, tpu.core_type = #tpu.core_type<tc>, window_params = [{transform_indices = @transform_0, window_bounds = array<i64: 8, 16, 128>}, {transform_indices = @transform_1, window_bounds = array<i64: 1, 128>}, {transform_indices = @transform_2, window_bounds = array<i64: 1, 128>}, {pipeline_mode = #tpu.pipeline_mode<synchronous>, transform_indices = @transform_3, window_bounds = array<i64: 48, 16>}, {pipeline_mode = #tpu.pipeline_mode<synchronous>, transform_indices = @transform_4, window_bounds = array<i64: 48, 16>}, {pipeline_mode = #tpu.pipeline_mode<synchronous>, transform_indices = @transform_5, window_bounds = array<i64: 48, 1>}, {pipeline_mode = #tpu.pipeline_mode<synchronous>, transform_indices = @transform_6, window_bounds = array<i64: 16, 1>}, {transform_indices = @transform_7, window_bounds = array<i64: 16, 128>}]} {
    %c0 = arith.constant 0 : index
    %c0_0 = arith.constant 0 : index
    %0 = vector.load %arg4[%c0, %c0_0] : memref<48x16xbf16, #tpu.memory_space<vmem>>, vector<48x16xbf16>
    %c0_1 = arith.constant 0 : index
    %c0_2 = arith.constant 0 : index
    %1 = vector.load %arg5[%c0_1, %c0_2] : memref<48x16xbf16, #tpu.memory_space<vmem>>, vector<48x16xbf16>
    %c0_3 = arith.constant 0 : index
    %c0_4 = arith.constant 0 : index
    %2 = vector.load %arg2[%c0_3, %c0_4] : memref<1x128xi32, #tpu.memory_space<vmem>>, vector<1x128xi32>
    %c0_5 = arith.constant 0 : index
    %c0_6 = arith.constant 0 : index
    %3 = vector.load %arg3[%c0_5, %c0_6] : memref<1x128xi32, #tpu.memory_space<vmem>>, vector<1x128xi32>
    %c0_7 = arith.constant 0 : index
    %c0_8 = arith.constant 0 : index
    %4 = vector.load %arg6[%c0_7, %c0_8] : memref<48x1xf32, #tpu.memory_space<vmem>>, vector<48x1xf32>
    %5 = vector.shape_cast %4 : vector<48x1xf32> to vector<48x1xf32>
    %6 = vector.broadcast %5 : vector<48x1xf32> to vector<48x128xf32>
    %c0_9 = arith.constant 0 : index
    %c0_10 = arith.constant 0 : index
    %7 = vector.load %arg7[%c0_9, %c0_10] : memref<16x1xf32, #tpu.memory_space<vmem>>, vector<16x1xf32>
    %8 = vector.shape_cast %7 : vector<16x1xf32> to vector<16x1xf32>
    %9 = vector.broadcast %8 : vector<16x1xf32> to vector<16x128xf32>
    %c0_11 = arith.constant 0 : index
    %c0_12 = arith.constant 0 : index
    %c0_13 = arith.constant 0 : index
    %10 = vector.load %arg1[%c0_11, %c0_12, %c0_13] : memref<8x16x128xbf16, #tpu.memory_space<vmem>>, vector<1x16x128xbf16>
    %11 = vector.shape_cast %10 : vector<1x16x128xbf16> to vector<16x128xbf16>
    %cst = arith.constant dense<0.000000e+00> : vector<48x128xf32>
    %12 = tpu.matmul %0, %11, %cst {dimension_numbers = #tpu.dot_dimension_numbers<[1], [0], [0], [1], [0, 0, 1, 1], [], []>} : vector<48x16xbf16>, vector<16x128xbf16>, vector<48x128xf32> -> vector<48x128xf32>
    %13 = arith.addf %12, %6 : vector<48x128xf32>
    %c1 = arith.constant 1 : index
    %c0_14 = arith.constant 0 : index
    %c0_15 = arith.constant 0 : index
    %14 = vector.load %arg1[%c1, %c0_14, %c0_15] : memref<8x16x128xbf16, #tpu.memory_space<vmem>>, vector<1x16x128xbf16>
    %15 = vector.shape_cast %14 : vector<1x16x128xbf16> to vector<16x128xbf16>
    %cst_16 = arith.constant dense<0.000000e+00> : vector<48x128xf32>
    %16 = tpu.matmul %0, %15, %cst_16 {dimension_numbers = #tpu.dot_dimension_numbers<[1], [0], [0], [1], [0, 0, 1, 1], [], []>} : vector<48x16xbf16>, vector<16x128xbf16>, vector<48x128xf32> -> vector<48x128xf32>
    %17 = arith.addf %16, %6 : vector<48x128xf32>
    %c2 = arith.constant 2 : index
    %c0_17 = arith.constant 0 : index
    %c0_18 = arith.constant 0 : index
    %18 = vector.load %arg1[%c2, %c0_17, %c0_18] : memref<8x16x128xbf16, #tpu.memory_space<vmem>>, vector<1x16x128xbf16>
    %19 = vector.shape_cast %18 : vector<1x16x128xbf16> to vector<16x128xbf16>
    %cst_19 = arith.constant dense<0.000000e+00> : vector<48x128xf32>
    %20 = tpu.matmul %0, %19, %cst_19 {dimension_numbers = #tpu.dot_dimension_numbers<[1], [0], [0], [1], [0, 0, 1, 1], [], []>} : vector<48x16xbf16>, vector<16x128xbf16>, vector<48x128xf32> -> vector<48x128xf32>
    %21 = arith.addf %20, %6 : vector<48x128xf32>
    %c3 = arith.constant 3 : index
    %c0_20 = arith.constant 0 : index
    %c0_21 = arith.constant 0 : index
    %22 = vector.load %arg1[%c3, %c0_20, %c0_21] : memref<8x16x128xbf16, #tpu.memory_space<vmem>>, vector<1x16x128xbf16>
    %23 = vector.shape_cast %22 : vector<1x16x128xbf16> to vector<16x128xbf16>
    %cst_22 = arith.constant dense<0.000000e+00> : vector<48x128xf32>
    %24 = tpu.matmul %0, %23, %cst_22 {dimension_numbers = #tpu.dot_dimension_numbers<[1], [0], [0], [1], [0, 0, 1, 1], [], []>} : vector<48x16xbf16>, vector<16x128xbf16>, vector<48x128xf32> -> vector<48x128xf32>
    %25 = arith.addf %24, %6 : vector<48x128xf32>
    %c4 = arith.constant 4 : index
    %c0_23 = arith.constant 0 : index
    %c0_24 = arith.constant 0 : index
    %26 = vector.load %arg1[%c4, %c0_23, %c0_24] : memref<8x16x128xbf16, #tpu.memory_space<vmem>>, vector<1x16x128xbf16>
    %27 = vector.shape_cast %26 : vector<1x16x128xbf16> to vector<16x128xbf16>
    %cst_25 = arith.constant dense<0.000000e+00> : vector<48x128xf32>
    %28 = tpu.matmul %0, %27, %cst_25 {dimension_numbers = #tpu.dot_dimension_numbers<[1], [0], [0], [1], [0, 0, 1, 1], [], []>} : vector<48x16xbf16>, vector<16x128xbf16>, vector<48x128xf32> -> vector<48x128xf32>
    %29 = arith.addf %28, %6 : vector<48x128xf32>
    %c5 = arith.constant 5 : index
    %c0_26 = arith.constant 0 : index
    %c0_27 = arith.constant 0 : index
    %30 = vector.load %arg1[%c5, %c0_26, %c0_27] : memref<8x16x128xbf16, #tpu.memory_space<vmem>>, vector<1x16x128xbf16>
    %31 = vector.shape_cast %30 : vector<1x16x128xbf16> to vector<16x128xbf16>
    %cst_28 = arith.constant dense<0.000000e+00> : vector<48x128xf32>
    %32 = tpu.matmul %0, %31, %cst_28 {dimension_numbers = #tpu.dot_dimension_numbers<[1], [0], [0], [1], [0, 0, 1, 1], [], []>} : vector<48x16xbf16>, vector<16x128xbf16>, vector<48x128xf32> -> vector<48x128xf32>
    %33 = arith.addf %32, %6 : vector<48x128xf32>
    %c6 = arith.constant 6 : index
    %c0_29 = arith.constant 0 : index
    %c0_30 = arith.constant 0 : index
    %34 = vector.load %arg1[%c6, %c0_29, %c0_30] : memref<8x16x128xbf16, #tpu.memory_space<vmem>>, vector<1x16x128xbf16>
    %35 = vector.shape_cast %34 : vector<1x16x128xbf16> to vector<16x128xbf16>
    %cst_31 = arith.constant dense<0.000000e+00> : vector<48x128xf32>
    %36 = tpu.matmul %0, %35, %cst_31 {dimension_numbers = #tpu.dot_dimension_numbers<[1], [0], [0], [1], [0, 0, 1, 1], [], []>} : vector<48x16xbf16>, vector<16x128xbf16>, vector<48x128xf32> -> vector<48x128xf32>
    %37 = arith.addf %36, %6 : vector<48x128xf32>
    %c7 = arith.constant 7 : index
    %c0_32 = arith.constant 0 : index
    %c0_33 = arith.constant 0 : index
    %38 = vector.load %arg1[%c7, %c0_32, %c0_33] : memref<8x16x128xbf16, #tpu.memory_space<vmem>>, vector<1x16x128xbf16>
    %39 = vector.shape_cast %38 : vector<1x16x128xbf16> to vector<16x128xbf16>
    %cst_34 = arith.constant dense<0.000000e+00> : vector<48x128xf32>
    %40 = tpu.matmul %0, %39, %cst_34 {dimension_numbers = #tpu.dot_dimension_numbers<[1], [0], [0], [1], [0, 0, 1, 1], [], []>} : vector<48x16xbf16>, vector<16x128xbf16>, vector<48x128xf32> -> vector<48x128xf32>
    %41 = arith.addf %40, %6 : vector<48x128xf32>
    %cst_35 = arith.constant 0.000000e+00 : f32
    %42 = vector.broadcast %cst_35 : f32 to vector<16x128xf32>
    %cst_36 = arith.constant 0.000000e+00 : f32
    %43 = vector.broadcast %cst_36 : f32 to vector<16x128xf32>
    %44 = arith.truncf %42 : vector<16x128xf32> to vector<16x128xbf16>
    %cst_37 = arith.constant dense<0.000000e+00> : vector<48x128xf32>
    %45 = tpu.matmul %1, %44, %cst_37 {dimension_numbers = #tpu.dot_dimension_numbers<[1], [0], [0], [1], [0, 0, 1, 1], [], []>} : vector<48x16xbf16>, vector<16x128xbf16>, vector<48x128xf32> -> vector<48x128xf32>
    %46 = vector.extract_strided_slice %13 {offsets = [0, 0], sizes = [32, 128], strides = [1, 1]} : vector<48x128xf32> to vector<32x128xf32>
    %47 = vector.extract_strided_slice %45 {offsets = [0, 0], sizes = [32, 128], strides = [1, 1]} : vector<48x128xf32> to vector<32x128xf32>
    %48 = arith.addf %46, %47 : vector<32x128xf32>
    %49 = arith.negf %48 : vector<32x128xf32>
    %50 = math.exp %49 : vector<32x128xf32>
    %cst_38 = arith.constant 1.000000e+00 : f32
    %51 = vector.broadcast %cst_38 : f32 to vector<32x128xf32>
    %52 = arith.addf %51, %50 : vector<32x128xf32>
    %53 = arith.divf %51, %52 : vector<32x128xf32>
    %54 = vector.extract_strided_slice %53 {offsets = [0, 0], sizes = [16, 128], strides = [1, 1]} : vector<32x128xf32> to vector<16x128xf32>
    %55 = vector.extract_strided_slice %53 {offsets = [16, 0], sizes = [16, 128], strides = [1, 1]} : vector<32x128xf32> to vector<16x128xf32>
    %56 = vector.extract_strided_slice %13 {offsets = [32, 0], sizes = [16, 128], strides = [1, 1]} : vector<48x128xf32> to vector<16x128xf32>
    %57 = vector.extract_strided_slice %45 {offsets = [32, 0], sizes = [16, 128], strides = [1, 1]} : vector<48x128xf32> to vector<16x128xf32>
    %58 = arith.addf %57, %9 : vector<16x128xf32>
    %59 = arith.mulf %54, %58 : vector<16x128xf32>
    %60 = arith.addf %56, %59 : vector<16x128xf32>
    %61 = math.tanh %60 : vector<16x128xf32>
    %cst_39 = arith.constant 1.000000e+00 : f32
    %62 = vector.broadcast %cst_39 : f32 to vector<16x128xf32>
    %63 = arith.subf %62, %55 : vector<16x128xf32>
    %64 = arith.mulf %63, %61 : vector<16x128xf32>
    %65 = arith.mulf %55, %42 : vector<16x128xf32>
    %66 = arith.addf %64, %65 : vector<16x128xf32>
    %c0_i32 = arith.constant 0 : i32
    %67 = vector.broadcast %c0_i32 : i32 to vector<1x128xi32>
    %68 = arith.cmpi eq, %2, %67 : vector<1x128xi32>
    %69 = vector.shape_cast %68 : vector<1x128xi1> to vector<1x128xi1>
    %70 = vector.broadcast %69 : vector<1x128xi1> to vector<16x128xi1>
    %71 = arith.select %70, %66, %43 : vector<16x128xi1>, vector<16x128xf32>
    %72 = arith.truncf %66 : vector<16x128xf32> to vector<16x128xbf16>
    %cst_40 = arith.constant dense<0.000000e+00> : vector<48x128xf32>
    %73 = tpu.matmul %1, %72, %cst_40 {dimension_numbers = #tpu.dot_dimension_numbers<[1], [0], [0], [1], [0, 0, 1, 1], [], []>} : vector<48x16xbf16>, vector<16x128xbf16>, vector<48x128xf32> -> vector<48x128xf32>
    %74 = vector.extract_strided_slice %17 {offsets = [0, 0], sizes = [32, 128], strides = [1, 1]} : vector<48x128xf32> to vector<32x128xf32>
    %75 = vector.extract_strided_slice %73 {offsets = [0, 0], sizes = [32, 128], strides = [1, 1]} : vector<48x128xf32> to vector<32x128xf32>
    %76 = arith.addf %74, %75 : vector<32x128xf32>
    %77 = arith.negf %76 : vector<32x128xf32>
    %78 = math.exp %77 : vector<32x128xf32>
    %cst_41 = arith.constant 1.000000e+00 : f32
    %79 = vector.broadcast %cst_41 : f32 to vector<32x128xf32>
    %80 = arith.addf %79, %78 : vector<32x128xf32>
    %81 = arith.divf %79, %80 : vector<32x128xf32>
    %82 = vector.extract_strided_slice %81 {offsets = [0, 0], sizes = [16, 128], strides = [1, 1]} : vector<32x128xf32> to vector<16x128xf32>
    %83 = vector.extract_strided_slice %81 {offsets = [16, 0], sizes = [16, 128], strides = [1, 1]} : vector<32x128xf32> to vector<16x128xf32>
    %84 = vector.extract_strided_slice %17 {offsets = [32, 0], sizes = [16, 128], strides = [1, 1]} : vector<48x128xf32> to vector<16x128xf32>
    %85 = vector.extract_strided_slice %73 {offsets = [32, 0], sizes = [16, 128], strides = [1, 1]} : vector<48x128xf32> to vector<16x128xf32>
    %86 = arith.addf %85, %9 : vector<16x128xf32>
    %87 = arith.mulf %82, %86 : vector<16x128xf32>
    %88 = arith.addf %84, %87 : vector<16x128xf32>
    %89 = math.tanh %88 : vector<16x128xf32>
    %cst_42 = arith.constant 1.000000e+00 : f32
    %90 = vector.broadcast %cst_42 : f32 to vector<16x128xf32>
    %91 = arith.subf %90, %83 : vector<16x128xf32>
    %92 = arith.mulf %91, %89 : vector<16x128xf32>
    %93 = arith.mulf %83, %66 : vector<16x128xf32>
    %94 = arith.addf %92, %93 : vector<16x128xf32>
    %c1_i32 = arith.constant 1 : i32
    %95 = vector.broadcast %c1_i32 : i32 to vector<1x128xi32>
    %96 = arith.cmpi eq, %2, %95 : vector<1x128xi32>
    %97 = vector.shape_cast %96 : vector<1x128xi1> to vector<1x128xi1>
    %98 = vector.broadcast %97 : vector<1x128xi1> to vector<16x128xi1>
    %99 = arith.select %98, %94, %71 : vector<16x128xi1>, vector<16x128xf32>
    %100 = arith.truncf %94 : vector<16x128xf32> to vector<16x128xbf16>
    %cst_43 = arith.constant dense<0.000000e+00> : vector<48x128xf32>
    %101 = tpu.matmul %1, %100, %cst_43 {dimension_numbers = #tpu.dot_dimension_numbers<[1], [0], [0], [1], [0, 0, 1, 1], [], []>} : vector<48x16xbf16>, vector<16x128xbf16>, vector<48x128xf32> -> vector<48x128xf32>
    %102 = vector.extract_strided_slice %21 {offsets = [0, 0], sizes = [32, 128], strides = [1, 1]} : vector<48x128xf32> to vector<32x128xf32>
    %103 = vector.extract_strided_slice %101 {offsets = [0, 0], sizes = [32, 128], strides = [1, 1]} : vector<48x128xf32> to vector<32x128xf32>
    %104 = arith.addf %102, %103 : vector<32x128xf32>
    %105 = arith.negf %104 : vector<32x128xf32>
    %106 = math.exp %105 : vector<32x128xf32>
    %cst_44 = arith.constant 1.000000e+00 : f32
    %107 = vector.broadcast %cst_44 : f32 to vector<32x128xf32>
    %108 = arith.addf %107, %106 : vector<32x128xf32>
    %109 = arith.divf %107, %108 : vector<32x128xf32>
    %110 = vector.extract_strided_slice %109 {offsets = [0, 0], sizes = [16, 128], strides = [1, 1]} : vector<32x128xf32> to vector<16x128xf32>
    %111 = vector.extract_strided_slice %109 {offsets = [16, 0], sizes = [16, 128], strides = [1, 1]} : vector<32x128xf32> to vector<16x128xf32>
    %112 = vector.extract_strided_slice %21 {offsets = [32, 0], sizes = [16, 128], strides = [1, 1]} : vector<48x128xf32> to vector<16x128xf32>
    %113 = vector.extract_strided_slice %101 {offsets = [32, 0], sizes = [16, 128], strides = [1, 1]} : vector<48x128xf32> to vector<16x128xf32>
    %114 = arith.addf %113, %9 : vector<16x128xf32>
    %115 = arith.mulf %110, %114 : vector<16x128xf32>
    %116 = arith.addf %112, %115 : vector<16x128xf32>
    %117 = math.tanh %116 : vector<16x128xf32>
    %cst_45 = arith.constant 1.000000e+00 : f32
    %118 = vector.broadcast %cst_45 : f32 to vector<16x128xf32>
    %119 = arith.subf %118, %111 : vector<16x128xf32>
    %120 = arith.mulf %119, %117 : vector<16x128xf32>
    %121 = arith.mulf %111, %94 : vector<16x128xf32>
    %122 = arith.addf %120, %121 : vector<16x128xf32>
    %c2_i32 = arith.constant 2 : i32
    %123 = vector.broadcast %c2_i32 : i32 to vector<1x128xi32>
    %124 = arith.cmpi eq, %2, %123 : vector<1x128xi32>
    %125 = vector.shape_cast %124 : vector<1x128xi1> to vector<1x128xi1>
    %126 = vector.broadcast %125 : vector<1x128xi1> to vector<16x128xi1>
    %127 = arith.select %126, %122, %99 : vector<16x128xi1>, vector<16x128xf32>
    %128 = arith.truncf %122 : vector<16x128xf32> to vector<16x128xbf16>
    %cst_46 = arith.constant dense<0.000000e+00> : vector<48x128xf32>
    %129 = tpu.matmul %1, %128, %cst_46 {dimension_numbers = #tpu.dot_dimension_numbers<[1], [0], [0], [1], [0, 0, 1, 1], [], []>} : vector<48x16xbf16>, vector<16x128xbf16>, vector<48x128xf32> -> vector<48x128xf32>
    %130 = vector.extract_strided_slice %25 {offsets = [0, 0], sizes = [32, 128], strides = [1, 1]} : vector<48x128xf32> to vector<32x128xf32>
    %131 = vector.extract_strided_slice %129 {offsets = [0, 0], sizes = [32, 128], strides = [1, 1]} : vector<48x128xf32> to vector<32x128xf32>
    %132 = arith.addf %130, %131 : vector<32x128xf32>
    %133 = arith.negf %132 : vector<32x128xf32>
    %134 = math.exp %133 : vector<32x128xf32>
    %cst_47 = arith.constant 1.000000e+00 : f32
    %135 = vector.broadcast %cst_47 : f32 to vector<32x128xf32>
    %136 = arith.addf %135, %134 : vector<32x128xf32>
    %137 = arith.divf %135, %136 : vector<32x128xf32>
    %138 = vector.extract_strided_slice %137 {offsets = [0, 0], sizes = [16, 128], strides = [1, 1]} : vector<32x128xf32> to vector<16x128xf32>
    %139 = vector.extract_strided_slice %137 {offsets = [16, 0], sizes = [16, 128], strides = [1, 1]} : vector<32x128xf32> to vector<16x128xf32>
    %140 = vector.extract_strided_slice %25 {offsets = [32, 0], sizes = [16, 128], strides = [1, 1]} : vector<48x128xf32> to vector<16x128xf32>
    %141 = vector.extract_strided_slice %129 {offsets = [32, 0], sizes = [16, 128], strides = [1, 1]} : vector<48x128xf32> to vector<16x128xf32>
    %142 = arith.addf %141, %9 : vector<16x128xf32>
    %143 = arith.mulf %138, %142 : vector<16x128xf32>
    %144 = arith.addf %140, %143 : vector<16x128xf32>
    %145 = math.tanh %144 : vector<16x128xf32>
    %cst_48 = arith.constant 1.000000e+00 : f32
    %146 = vector.broadcast %cst_48 : f32 to vector<16x128xf32>
    %147 = arith.subf %146, %139 : vector<16x128xf32>
    %148 = arith.mulf %147, %145 : vector<16x128xf32>
    %149 = arith.mulf %139, %122 : vector<16x128xf32>
    %150 = arith.addf %148, %149 : vector<16x128xf32>
    %c3_i32 = arith.constant 3 : i32
    %151 = vector.broadcast %c3_i32 : i32 to vector<1x128xi32>
    %152 = arith.cmpi eq, %2, %151 : vector<1x128xi32>
    %153 = vector.shape_cast %152 : vector<1x128xi1> to vector<1x128xi1>
    %154 = vector.broadcast %153 : vector<1x128xi1> to vector<16x128xi1>
    %155 = arith.select %154, %150, %127 : vector<16x128xi1>, vector<16x128xf32>
    %156 = arith.truncf %150 : vector<16x128xf32> to vector<16x128xbf16>
    %cst_49 = arith.constant dense<0.000000e+00> : vector<48x128xf32>
    %157 = tpu.matmul %1, %156, %cst_49 {dimension_numbers = #tpu.dot_dimension_numbers<[1], [0], [0], [1], [0, 0, 1, 1], [], []>} : vector<48x16xbf16>, vector<16x128xbf16>, vector<48x128xf32> -> vector<48x128xf32>
    %158 = vector.extract_strided_slice %29 {offsets = [0, 0], sizes = [32, 128], strides = [1, 1]} : vector<48x128xf32> to vector<32x128xf32>
    %159 = vector.extract_strided_slice %157 {offsets = [0, 0], sizes = [32, 128], strides = [1, 1]} : vector<48x128xf32> to vector<32x128xf32>
    %160 = arith.addf %158, %159 : vector<32x128xf32>
    %161 = arith.negf %160 : vector<32x128xf32>
    %162 = math.exp %161 : vector<32x128xf32>
    %cst_50 = arith.constant 1.000000e+00 : f32
    %163 = vector.broadcast %cst_50 : f32 to vector<32x128xf32>
    %164 = arith.addf %163, %162 : vector<32x128xf32>
    %165 = arith.divf %163, %164 : vector<32x128xf32>
    %166 = vector.extract_strided_slice %165 {offsets = [0, 0], sizes = [16, 128], strides = [1, 1]} : vector<32x128xf32> to vector<16x128xf32>
    %167 = vector.extract_strided_slice %165 {offsets = [16, 0], sizes = [16, 128], strides = [1, 1]} : vector<32x128xf32> to vector<16x128xf32>
    %168 = vector.extract_strided_slice %29 {offsets = [32, 0], sizes = [16, 128], strides = [1, 1]} : vector<48x128xf32> to vector<16x128xf32>
    %169 = vector.extract_strided_slice %157 {offsets = [32, 0], sizes = [16, 128], strides = [1, 1]} : vector<48x128xf32> to vector<16x128xf32>
    %170 = arith.addf %169, %9 : vector<16x128xf32>
    %171 = arith.mulf %166, %170 : vector<16x128xf32>
    %172 = arith.addf %168, %171 : vector<16x128xf32>
    %173 = math.tanh %172 : vector<16x128xf32>
    %cst_51 = arith.constant 1.000000e+00 : f32
    %174 = vector.broadcast %cst_51 : f32 to vector<16x128xf32>
    %175 = arith.subf %174, %167 : vector<16x128xf32>
    %176 = arith.mulf %175, %173 : vector<16x128xf32>
    %177 = arith.mulf %167, %150 : vector<16x128xf32>
    %178 = arith.addf %176, %177 : vector<16x128xf32>
    %c4_i32 = arith.constant 4 : i32
    %179 = vector.broadcast %c4_i32 : i32 to vector<1x128xi32>
    %180 = arith.cmpi eq, %2, %179 : vector<1x128xi32>
    %181 = vector.shape_cast %180 : vector<1x128xi1> to vector<1x128xi1>
    %182 = vector.broadcast %181 : vector<1x128xi1> to vector<16x128xi1>
    %183 = arith.select %182, %178, %155 : vector<16x128xi1>, vector<16x128xf32>
    %184 = arith.truncf %178 : vector<16x128xf32> to vector<16x128xbf16>
    %cst_52 = arith.constant dense<0.000000e+00> : vector<48x128xf32>
    %185 = tpu.matmul %1, %184, %cst_52 {dimension_numbers = #tpu.dot_dimension_numbers<[1], [0], [0], [1], [0, 0, 1, 1], [], []>} : vector<48x16xbf16>, vector<16x128xbf16>, vector<48x128xf32> -> vector<48x128xf32>
    %186 = vector.extract_strided_slice %33 {offsets = [0, 0], sizes = [32, 128], strides = [1, 1]} : vector<48x128xf32> to vector<32x128xf32>
    %187 = vector.extract_strided_slice %185 {offsets = [0, 0], sizes = [32, 128], strides = [1, 1]} : vector<48x128xf32> to vector<32x128xf32>
    %188 = arith.addf %186, %187 : vector<32x128xf32>
    %189 = arith.negf %188 : vector<32x128xf32>
    %190 = math.exp %189 : vector<32x128xf32>
    %cst_53 = arith.constant 1.000000e+00 : f32
    %191 = vector.broadcast %cst_53 : f32 to vector<32x128xf32>
    %192 = arith.addf %191, %190 : vector<32x128xf32>
    %193 = arith.divf %191, %192 : vector<32x128xf32>
    %194 = vector.extract_strided_slice %193 {offsets = [0, 0], sizes = [16, 128], strides = [1, 1]} : vector<32x128xf32> to vector<16x128xf32>
    %195 = vector.extract_strided_slice %193 {offsets = [16, 0], sizes = [16, 128], strides = [1, 1]} : vector<32x128xf32> to vector<16x128xf32>
    %196 = vector.extract_strided_slice %33 {offsets = [32, 0], sizes = [16, 128], strides = [1, 1]} : vector<48x128xf32> to vector<16x128xf32>
    %197 = vector.extract_strided_slice %185 {offsets = [32, 0], sizes = [16, 128], strides = [1, 1]} : vector<48x128xf32> to vector<16x128xf32>
    %198 = arith.addf %197, %9 : vector<16x128xf32>
    %199 = arith.mulf %194, %198 : vector<16x128xf32>
    %200 = arith.addf %196, %199 : vector<16x128xf32>
    %201 = math.tanh %200 : vector<16x128xf32>
    %cst_54 = arith.constant 1.000000e+00 : f32
    %202 = vector.broadcast %cst_54 : f32 to vector<16x128xf32>
    %203 = arith.subf %202, %195 : vector<16x128xf32>
    %204 = arith.mulf %203, %201 : vector<16x128xf32>
    %205 = arith.mulf %195, %178 : vector<16x128xf32>
    %206 = arith.addf %204, %205 : vector<16x128xf32>
    %c5_i32 = arith.constant 5 : i32
    %207 = vector.broadcast %c5_i32 : i32 to vector<1x128xi32>
    %208 = arith.cmpi eq, %2, %207 : vector<1x128xi32>
    %209 = vector.shape_cast %208 : vector<1x128xi1> to vector<1x128xi1>
    %210 = vector.broadcast %209 : vector<1x128xi1> to vector<16x128xi1>
    %211 = arith.select %210, %206, %183 : vector<16x128xi1>, vector<16x128xf32>
    %212 = arith.truncf %206 : vector<16x128xf32> to vector<16x128xbf16>
    %cst_55 = arith.constant dense<0.000000e+00> : vector<48x128xf32>
    %213 = tpu.matmul %1, %212, %cst_55 {dimension_numbers = #tpu.dot_dimension_numbers<[1], [0], [0], [1], [0, 0, 1, 1], [], []>} : vector<48x16xbf16>, vector<16x128xbf16>, vector<48x128xf32> -> vector<48x128xf32>
    %214 = vector.extract_strided_slice %37 {offsets = [0, 0], sizes = [32, 128], strides = [1, 1]} : vector<48x128xf32> to vector<32x128xf32>
    %215 = vector.extract_strided_slice %213 {offsets = [0, 0], sizes = [32, 128], strides = [1, 1]} : vector<48x128xf32> to vector<32x128xf32>
    %216 = arith.addf %214, %215 : vector<32x128xf32>
    %217 = arith.negf %216 : vector<32x128xf32>
    %218 = math.exp %217 : vector<32x128xf32>
    %cst_56 = arith.constant 1.000000e+00 : f32
    %219 = vector.broadcast %cst_56 : f32 to vector<32x128xf32>
    %220 = arith.addf %219, %218 : vector<32x128xf32>
    %221 = arith.divf %219, %220 : vector<32x128xf32>
    %222 = vector.extract_strided_slice %221 {offsets = [0, 0], sizes = [16, 128], strides = [1, 1]} : vector<32x128xf32> to vector<16x128xf32>
    %223 = vector.extract_strided_slice %221 {offsets = [16, 0], sizes = [16, 128], strides = [1, 1]} : vector<32x128xf32> to vector<16x128xf32>
    %224 = vector.extract_strided_slice %37 {offsets = [32, 0], sizes = [16, 128], strides = [1, 1]} : vector<48x128xf32> to vector<16x128xf32>
    %225 = vector.extract_strided_slice %213 {offsets = [32, 0], sizes = [16, 128], strides = [1, 1]} : vector<48x128xf32> to vector<16x128xf32>
    %226 = arith.addf %225, %9 : vector<16x128xf32>
    %227 = arith.mulf %222, %226 : vector<16x128xf32>
    %228 = arith.addf %224, %227 : vector<16x128xf32>
    %229 = math.tanh %228 : vector<16x128xf32>
    %cst_57 = arith.constant 1.000000e+00 : f32
    %230 = vector.broadcast %cst_57 : f32 to vector<16x128xf32>
    %231 = arith.subf %230, %223 : vector<16x128xf32>
    %232 = arith.mulf %231, %229 : vector<16x128xf32>
    %233 = arith.mulf %223, %206 : vector<16x128xf32>
    %234 = arith.addf %232, %233 : vector<16x128xf32>
    %c6_i32 = arith.constant 6 : i32
    %235 = vector.broadcast %c6_i32 : i32 to vector<1x128xi32>
    %236 = arith.cmpi eq, %2, %235 : vector<1x128xi32>
    %237 = vector.shape_cast %236 : vector<1x128xi1> to vector<1x128xi1>
    %238 = vector.broadcast %237 : vector<1x128xi1> to vector<16x128xi1>
    %239 = arith.select %238, %234, %211 : vector<16x128xi1>, vector<16x128xf32>
    %240 = arith.truncf %234 : vector<16x128xf32> to vector<16x128xbf16>
    %cst_58 = arith.constant dense<0.000000e+00> : vector<48x128xf32>
    %241 = tpu.matmul %1, %240, %cst_58 {dimension_numbers = #tpu.dot_dimension_numbers<[1], [0], [0], [1], [0, 0, 1, 1], [], []>} : vector<48x16xbf16>, vector<16x128xbf16>, vector<48x128xf32> -> vector<48x128xf32>
    %242 = vector.extract_strided_slice %41 {offsets = [0, 0], sizes = [32, 128], strides = [1, 1]} : vector<48x128xf32> to vector<32x128xf32>
    %243 = vector.extract_strided_slice %241 {offsets = [0, 0], sizes = [32, 128], strides = [1, 1]} : vector<48x128xf32> to vector<32x128xf32>
    %244 = arith.addf %242, %243 : vector<32x128xf32>
    %245 = arith.negf %244 : vector<32x128xf32>
    %246 = math.exp %245 : vector<32x128xf32>
    %cst_59 = arith.constant 1.000000e+00 : f32
    %247 = vector.broadcast %cst_59 : f32 to vector<32x128xf32>
    %248 = arith.addf %247, %246 : vector<32x128xf32>
    %249 = arith.divf %247, %248 : vector<32x128xf32>
    %250 = vector.extract_strided_slice %249 {offsets = [0, 0], sizes = [16, 128], strides = [1, 1]} : vector<32x128xf32> to vector<16x128xf32>
    %251 = vector.extract_strided_slice %249 {offsets = [16, 0], sizes = [16, 128], strides = [1, 1]} : vector<32x128xf32> to vector<16x128xf32>
    %252 = vector.extract_strided_slice %41 {offsets = [32, 0], sizes = [16, 128], strides = [1, 1]} : vector<48x128xf32> to vector<16x128xf32>
    %253 = vector.extract_strided_slice %241 {offsets = [32, 0], sizes = [16, 128], strides = [1, 1]} : vector<48x128xf32> to vector<16x128xf32>
    %254 = arith.addf %253, %9 : vector<16x128xf32>
    %255 = arith.mulf %250, %254 : vector<16x128xf32>
    %256 = arith.addf %252, %255 : vector<16x128xf32>
    %257 = math.tanh %256 : vector<16x128xf32>
    %cst_60 = arith.constant 1.000000e+00 : f32
    %258 = vector.broadcast %cst_60 : f32 to vector<16x128xf32>
    %259 = arith.subf %258, %251 : vector<16x128xf32>
    %260 = arith.mulf %259, %257 : vector<16x128xf32>
    %261 = arith.mulf %251, %234 : vector<16x128xf32>
    %262 = arith.addf %260, %261 : vector<16x128xf32>
    %c7_i32 = arith.constant 7 : i32
    %263 = vector.broadcast %c7_i32 : i32 to vector<1x128xi32>
    %264 = arith.cmpi eq, %2, %263 : vector<1x128xi32>
    %265 = vector.shape_cast %264 : vector<1x128xi1> to vector<1x128xi1>
    %266 = vector.broadcast %265 : vector<1x128xi1> to vector<16x128xi1>
    %267 = arith.select %266, %262, %239 : vector<16x128xi1>, vector<16x128xf32>
    %c1_i32_61 = arith.constant 1 : i32
    %268 = vector.broadcast %c1_i32_61 : i32 to vector<1x128xi32>
    %269 = arith.maxsi %3, %268 : vector<1x128xi32>
    %270 = arith.cmpi slt, %2, %269 : vector<1x128xi32>
    %cst_62 = arith.constant 0.000000e+00 : f32
    %271 = vector.shape_cast %270 : vector<1x128xi1> to vector<1x128xi1>
    %272 = vector.broadcast %271 : vector<1x128xi1> to vector<16x128xi1>
    %273 = vector.broadcast %cst_62 : f32 to vector<16x128xf32>
    %274 = arith.select %272, %267, %273 : vector<16x128xi1>, vector<16x128xf32>
    %c0_63 = arith.constant 0 : index
    %c0_64 = arith.constant 0 : index
    %275 = vector.load %arg8[%c0_63, %c0_64] : memref<16x128xf32, #tpu.memory_space<vmem>>, vector<16x128xf32>
    tpu.vector_store %arg8[%c0_63, %c0_64], %274 {strides = array<i32>} : memref<16x128xf32, #tpu.memory_space<vmem>>, vector<16x128xf32>,
    return
  }
  func.func @transform_0(%arg0: i32) -> (i32, i32, i32) {
    %c0_i32 = arith.constant 0 : i32
    %c0_i32_0 = arith.constant 0 : i32
    %c0_i32_1 = arith.constant 0 : i32
    return %c0_i32, %c0_i32_0, %arg0 : i32, i32, i32
  }
  func.func @transform_1(%arg0: i32) -> (i32, i32) {
    %c0_i32 = arith.constant 0 : i32
    %c0_i32_0 = arith.constant 0 : i32
    return %c0_i32, %arg0 : i32, i32
  }
  func.func @transform_2(%arg0: i32) -> (i32, i32) {
    %c0_i32 = arith.constant 0 : i32
    %c0_i32_0 = arith.constant 0 : i32
    return %c0_i32, %arg0 : i32, i32
  }
  func.func @transform_3(%arg0: i32) -> (i32, i32) {
    %c0_i32 = arith.constant 0 : i32
    %c0_i32_0 = arith.constant 0 : i32
    %c0_i32_1 = arith.constant 0 : i32
    return %c0_i32, %c0_i32_0 : i32, i32
  }
  func.func @transform_4(%arg0: i32) -> (i32, i32) {
    %c0_i32 = arith.constant 0 : i32
    %c0_i32_0 = arith.constant 0 : i32
    %c0_i32_1 = arith.constant 0 : i32
    return %c0_i32, %c0_i32_0 : i32, i32
  }
  func.func @transform_5(%arg0: i32) -> (i32, i32) {
    %c0_i32 = arith.constant 0 : i32
    %c0_i32_0 = arith.constant 0 : i32
    %c0_i32_1 = arith.constant 0 : i32
    return %c0_i32, %c0_i32_0 : i32, i32
  }
  func.func @transform_6(%arg0: i32) -> (i32, i32) {
    %c0_i32 = arith.constant 0 : i32
    %c0_i32_0 = arith.constant 0 : i32
    %c0_i32_1 = arith.constant 0 : i32
    return %c0_i32, %c0_i32_0 : i32, i32
  }
  func.func @transform_7(%arg0: i32) -> (i32, i32) {
    %c0_i32 = arith.constant 0 : i32
    %c0_i32_0 = arith.constant 0 : i32
    return %c0_i32, %arg0 : i32, i32
  }
}

</mosaic_0001>

<bundles_post_ra>
// kernel: msg_encoder_forward.1
= control target key start
LH: loop header
LB: loop body
LE: loop exit
PB: predicated region body
PF: predicated region fallthrough
CT: control target
= control target key end

     0   :  { %v2418_v1 = vmov 0   ;;  %vm112_vm0 = vcmask 130048   ;;  %s2410_s0 = inlined_call_operand.vmem [shape: bf16[8,16,128], index: 0, kind: input, shape index: {}]   ;;  %s2411_s3 = inlined_call_operand.vmem [shape: bf16[48,16], index: 3, kind: input, shape index: {}]   ;;  %s2412_s5 = inlined_call_operand.vmem [shape: f32[48,1], index: 5, kind: input, shape index: {}]   ;;  %s2413_s4 = inlined_call_operand.vmem [shape: bf16[48,16], index: 4, kind: input, shape index: {}]   ;;  %s2414_s6 = inlined_call_operand.vmem [shape: f32[16,1], index: 6, kind: input, shape index: {}]   ;;  %s2415_s1 = inlined_call_operand.vmem [shape: s32[1,128], index: 1, kind: input, shape index: {}]   ;;  %s2416_s2 = inlined_call_operand.vmem [shape: s32[1,128], index: 2, kind: input, shape index: {}]   ;;  %s2417_s7 = inlined_call_operand.vmem [shape: f32[16,128], index: 7, kind: output, shape index: {}]  }
   0x1   :  { %v1586_v0 = vld [vmem:[%s2410_s0] sm:$0xff]  ;;  %1595 = vset.pattern.permute.xlu0 %v2418_v1  ;;  %1596 = vset.pattern.permute.xlu1 %v2418_v1  ;;  %v1588_v4 = vld [vmem:[%s2410_s0 + $0x10] sm:$0xff]  ;;  %v1589_v5 = vld [vmem:[%s2410_s0 + $0x18] sm:$0xff] }
   0x2   :  { %v41_v2 = vld [vmem:[%s2412_s5] sm:$0xff]  ;;  %1597 = vset.pattern.permute.xlu2 %v2418_v1  ;;  %129 = vmatpush.bf16.msra.mxu0 %v1586_v0  ;;  %v1587_v6 = vld [vmem:[%s2410_s0 + $0x8] sm:$0xff]  ;;  %v43_v7 = vld [vmem:[%s2412_s5 + $0x10] sm:$0xff] }
   0x3   :  { %v1580_v3 = vld [vmem:[%s2411_s3] sm:$0xff]  ;;  %49 = vperm.xlu0 %1595, %v41_v2   ;;  %195 = vmatpush.bf16.msra.mxu2 %v1588_v4  ;;  %v42_v9 = vld [vmem:[%s2412_s5 + $0x8] sm:$0xff]  ;;  %v44_v10 = vld [vmem:[%s2412_s5 + $0x18] sm:$0xff] }
   0x4   :  { %228 = vmatpush.bf16.msra.mxu3 %v1589_v5  ;;  %162 = vmatpush.bf16.msra.mxu1 %v1587_v6  ;;  %v1590_v8 = vld [vmem:[%s2410_s0 + $0x20] sm:$0xff]  ;;  %v1581_v12 = vld [vmem:[%s2411_s3 + $0x8] sm:$0xff]  ;;  %v1592_v14 = vld [vmem:[%s2410_s0 + $0x30] sm:$0xff] }
   0x5   :  { %59 = vperm.xlu1 %1596, %v43_v7   ;;  %1446 = vmatmul.msk.bf16.vlgmr.msra.gmra.mxu0 %vm112_vm0, %v1580_v3  ;;  %v45_v11 = vld [vmem:[%s2412_s5 + $0x20] sm:$0xff]  ;;  %v46_v13 = vld [vmem:[%s2412_s5 + $0x28] sm:$0xff]  ;;  %v1593_v15 = vld [vmem:[%s2410_s0 + $0x38] sm:$0xff] }
   0x6   :  { %1464 = vmatmul.msk.bf16.vlgmr.msra.gmra.mxu2 %vm112_vm0, %v1580_v3  ;;  %261 = vmatpush.bf16.msrb.mxu0 %v1590_v8  ;;  %v1582_v16 = vld [vmem:[%s2411_s3 + $0x10] sm:$0xff]  ;;  %v1591_v17 = vld [vmem:[%s2410_s0 + $0x28] sm:$0xff]  ;;  %v1884_v18 = vld [vmem:[%s2413_s4] sm:$0xff] }
   0x7   :  { %1473 = vmatmul.msk.bf16.vlgmr.msra.gmra.mxu3 %vm112_vm0, %v1580_v3  ;;  %1455 = vmatmul.msk.bf16.vlgmr.msra.gmra.mxu1 %vm112_vm0, %v1580_v3  ;;  %v1891_v19 = vld [vmem:[%s2413_s4 + $0x8] sm:$0xff]  ;;  %v1898_v20 = vld [vmem:[%s2413_s4 + $0x10] sm:$0xff]  ;;  %v77_v23 = vld [vmem:[%s2414_s6] sm:$0xff] }
   0x8   :  { %327 = vmatpush.bf16.msrb.mxu2 %v1592_v14  ;;  %360 = vmatpush.bf16.msrb.mxu3 %v1593_v15  ;;  %v78_v31 = vld [vmem:[%s2414_s6 + $0x8] sm:$0xff] }
   0x9   :  { %294 = vmatpush.bf16.msrb.mxu1 %v1591_v17  ;;  %81 = vperm.xlu2 %1597, %v77_v23  }
   0xa   :  { %408 = vmatpush.bf16.msra.mxu0 %v2418_v1 }
   0xb   :  { %54 = vperm.xlu0 %1595, %v42_v9  }
   0xd   :  { %64 = vperm.xlu1 %1596, %v44_v10  }
  0x11   :  { %86 = vperm.xlu2 %1597, %v78_v31  }
  0x13   :  { %69 = vperm.xlu0 %1595, %v45_v11  }
  0x15   :  { %1447 = vmatmul.msk.bf16.gmra.mxu0 %vm112_vm0, %v1581_v12  ;;  %74 = vperm.xlu1 %1596, %v46_v13  }
  0x16   :  { %1465 = vmatmul.msk.bf16.gmra.mxu2 %vm112_vm0, %v1581_v12 }
  0x17   :  { %1474 = vmatmul.msk.bf16.gmra.mxu3 %vm112_vm0, %v1581_v12  ;;  %1456 = vmatmul.msk.bf16.gmra.mxu1 %vm112_vm0, %v1581_v12 }
  0x25   :  { %1448 = vmatmul.msk.bf16.gmra.mxu0 %vm112_vm0, %v1582_v16 }
  0x26   :  { %1466 = vmatmul.msk.bf16.gmra.mxu2 %vm112_vm0, %v1582_v16 }
  0x27   :  { %1475 = vmatmul.msk.bf16.gmra.mxu3 %vm112_vm0, %v1582_v16  ;;  %1457 = vmatmul.msk.bf16.gmra.mxu1 %vm112_vm0, %v1582_v16 }
  0x35   :  { %1482 = vmatmul.msk.bf16.vlgmr.msrb.gmra.mxu0 %vm112_vm0, %v1580_v3 }
  0x36   :  { %1500 = vmatmul.msk.bf16.vlgmr.msrb.gmra.mxu2 %vm112_vm0, %v1580_v3 }
  0x37   :  { %1509 = vmatmul.msk.bf16.vlgmr.msrb.gmra.mxu3 %vm112_vm0, %v1580_v3  ;;  %1491 = vmatmul.msk.bf16.vlgmr.msrb.gmra.mxu1 %vm112_vm0, %v1580_v3 }
  0x45   :  { %1483 = vmatmul.msk.bf16.gmra.mxu0 %vm112_vm0, %v1581_v12 }
  0x46   :  { %1501 = vmatmul.msk.bf16.gmra.mxu2 %vm112_vm0, %v1581_v12 }
  0x47   :  { %1510 = vmatmul.msk.bf16.gmra.mxu3 %vm112_vm0, %v1581_v12  ;;  %1492 = vmatmul.msk.bf16.gmra.mxu1 %vm112_vm0, %v1581_v12 }
  0x55   :  { %1484 = vmatmul.msk.bf16.gmra.mxu0 %vm112_vm0, %v1582_v16 }
  0x56   :  { %1502 = vmatmul.msk.bf16.gmra.mxu2 %vm112_vm0, %v1582_v16 }
  0x57   :  { %1511 = vmatmul.msk.bf16.gmra.mxu3 %vm112_vm0, %v1582_v16  ;;  %1493 = vmatmul.msk.bf16.gmra.mxu1 %vm112_vm0, %v1582_v16 }
  0x65   :  { %1524 = vmatmul.msk.bf16.vlgmr.msra.gmra.mxu0 %vm112_vm0, %v1884_v18 }
  0x75   :  { %1525 = vmatmul.msk.bf16.gmra.mxu0 %vm112_vm0, %v1891_v19  ;;  %v1900_v21 = vpop.permute.xlu0 %49 }
  0x77   :  { %v1938_v41 = vpop.permute.xlu1 %59 }
  0x7d   :  { %v1923_v32 = vpop.permute.xlu0 %54 }
  0x7f   :  { %v1954_v49 = vpop.permute.xlu1 %64 }
  0x82   :  { %v1902_v22 = vpop.f32.mrf.mxu0 }
  0x84   :  { %v164_v24 = vpop.f32.mrf.mxu1 }
  0x85   :  { %1526 = vmatmul.msk.bf16.gmra.mxu0 %vm112_vm0, %v1898_v20  ;;  %v1910_v25 = vadd.f32 %v164_v24, %v1900_v21  ;;  %v1956_v50 = vpop.permute.xlu0 %69 }
  0x87   :  { %v1969_v58 = vpop.permute.xlu1 %74 }
  0x89   :  { %v197_v26 = vpop.f32.mrf.mxu2 }
  0x8a   :  { %v230_v27 = vpop.f32.mrf.mxu3  ;;  %v1912_v28 = vpop.f32.mrf.mxu0  ;;  %v1915_v29 = vadd.f32 %v197_v26, %v1900_v21 }
  0x8b   :  { %v1918_v30 = vadd.f32 %v230_v27, %v1900_v21 }
  0x8c   :  { %v166_v33 = vpop.f32.mrf.mxu1 }
  0x8d   :  { %v1926_v34 = vadd.f32 %v166_v33, %v1923_v32 }
  0x91   :  { %v199_v35 = vpop.f32.mrf.mxu2 }
  0x92   :  { %v232_v36 = vpop.f32.mrf.mxu3  ;;  %v1928_v37 = vpop.f32.mrf.mxu0  ;;  %v1931_v38 = vadd.f32 %v199_v35, %v1923_v32 }
  0x93   :  { %v1934_v39 = vadd.f32 %v232_v36, %v1923_v32 }
  0x94   :  { %v1936_v40 = vpop.f32.mrf.mxu1 }
  0x99   :  { %v1940_v42 = vpop.f32.mrf.mxu2 }
  0x9a   :  { %v1942_v43 = vpop.f32.mrf.mxu3  ;;  %v1944_v44 = vpop.f32.mrf.mxu0 }
  0x9c   :  { %v1946_v45 = vpop.f32.mrf.mxu1 }
  0xa1   :  { %v1948_v46 = vpop.f32.mrf.mxu2 }
  0xa2   :  { %v1950_v47 = vpop.f32.mrf.mxu3  ;;  %v1952_v48 = vpop.f32.mrf.mxu0 }
  0xa4   :  { %v174_v51 = vpop.f32.mrf.mxu1 }
  0xa5   :  { %v1959_v52 = vadd.f32 %v174_v51, %v1956_v50 }
  0xa9   :  { %v207_v53 = vpop.f32.mrf.mxu2 }
  0xaa   :  { %v240_v54 = vpop.f32.mrf.mxu3  ;;  %v1961_v55 = vpop.f32.mrf.mxu0  ;;  %v1964_v56 = vadd.f32 %v207_v53, %v1956_v50 }
  0xab   :  { %v1967_v57 = vadd.f32 %v240_v54, %v1956_v50 }
  0xac   :  { %v176_v59 = vpop.f32.mrf.mxu1 }
  0xad   :  { %v1972_v60 = vadd.f32 %v176_v59, %v1969_v58 }
  0xb1   :  { %v209_v61 = vpop.f32.mrf.mxu2 }
  0xb2   :  { %v242_v62 = vpop.f32.mrf.mxu3  ;;  %v263_v63 = vpop.f32.mrf.mxu0  ;;  %v1975_v0 = vadd.f32 %v209_v61, %v1969_v58 }
  0xb3   :  { %v1978_v2 = vadd.f32 %v242_v62, %v1969_v58  ;;  %v1981_v3 = vadd.f32 %v263_v63, %v1900_v21 }
  0xb4   :  { %v296_v4 = vpop.f32.mrf.mxu1 }
  0xb5   :  { %v1984_v5 = vadd.f32 %v296_v4, %v1900_v21 }
  0xb9   :  { %v329_v6 = vpop.f32.mrf.mxu2 }
  0xba   :  { %v362_v7 = vpop.f32.mrf.mxu3  ;;  %v265_v8 = vpop.f32.mrf.mxu0  ;;  %v1987_v9 = vadd.f32 %v329_v6, %v1900_v21 }
  0xbb   :  { %v1990_v10 = vadd.f32 %v362_v7, %v1900_v21  ;;  %v1993_v11 = vadd.f32 %v265_v8, %v1923_v32  ;;  %v132_v8 = vadd.f32 %v1902_v22, %v1900_v21 }
  0xbc   :  { %v298_v12 = vpop.f32.mrf.mxu1 }
  0xbd   :  { %2420 = vst [vmem:[#allocation2_spill] sm:$0xff] %v1990_v10  ;;  %v1996_v13 = vadd.f32 %v298_v12, %v1923_v32 }
  0xc1   :  { %v331_v14 = vpop.f32.mrf.mxu2 }
  0xc2   :  { %v364_v15 = vpop.f32.mrf.mxu3  ;;  %v1998_v16 = vpop.f32.mrf.mxu0  ;;  %v2001_v17 = vadd.f32 %v331_v14, %v1923_v32 }
  0xc3   :  { %v2004_v23 = vadd.f32 %v364_v15, %v1923_v32 }
  0xc4   :  { %v2006_v24 = vpop.f32.mrf.mxu1 }
  0xc5   :  { %2421 = vst [vmem:[#allocation3_spill] sm:$0xff] %v2004_v23 }
  0xc9   :  { %v2008_v26 = vpop.f32.mrf.mxu2 }
  0xca   :  { %2422 = vst [vmem:[#allocation4_spill] sm:$0xff] %v2008_v26  ;;  %v2010_v27 = vpop.f32.mrf.mxu3  ;;  %v2012_v31 = vpop.f32.mrf.mxu0 }
  0xcb   :  { %2423 = vst [vmem:[#allocation5_spill] sm:$0xff] %v2010_v27 }
  0xcc   :  { %v2014_v33 = vpop.f32.mrf.mxu1 }
  0xd1   :  { %v2016_v35 = vpop.f32.mrf.mxu2 }
  0xd2   :  { %2424 = vst [vmem:[#allocation6_spill] sm:$0xff] %v2016_v35  ;;  %v2018_v36 = vpop.f32.mrf.mxu3  ;;  %v273_v51 = vpop.f32.mrf.mxu0 }
  0xd3   :  { %2425 = vst [vmem:[#allocation7_spill] sm:$0xff] %v2018_v36  ;;  %v2021_v53 = vadd.f32 %v273_v51, %v1956_v50  ;;  %v134_v51 = vadd.f32 %v1912_v28, %v1923_v32  ;;  %v139_v28 = vadd.f32 %v1944_v44, %v1954_v49 }
  0xd4   :  { %v306_v54 = vpop.f32.mrf.mxu1 }
  0xd5   :  { %v2024_v59 = vadd.f32 %v306_v54, %v1956_v50 }
  0xd9   :  { %v339_v61 = vpop.f32.mrf.mxu2 }
  0xda   :  { %v372_v62 = vpop.f32.mrf.mxu3  ;;  %v275_v63 = vpop.f32.mrf.mxu0  ;;  %v2027_v4 = vadd.f32 %v339_v61, %v1956_v50 }
  0xdb   :  { %v2030_v6 = vadd.f32 %v372_v62, %v1956_v50  ;;  %v2033_v7 = vadd.f32 %v275_v63, %v1969_v58  ;;  %v137_v62 = vadd.f32 %v1928_v37, %v1938_v41 }
  0xdc   :  { %2426 = vst [vmem:[#allocation8_spill] sm:$0xff] %v2027_v4 }
  0xdd   :  { %2427 = vst [vmem:[#allocation9_spill] sm:$0xff] %v2030_v6 }
  0xe2   :  { %v410_v12 = vpop.f32.mrf.mxu0 }
  0xe3   :  { %v425_v14 = vadd.f32 %v410_v12, %v132_v8 }
  0xe5   :  { %v1527_v15 = vmul.f32 -1.442695, %v425_v14 }
  0xe7   :  { %1598 = vpow2.f32 %v1527_v15 }
  0xea   :  { %v412_v54 = vpop.f32.mrf.mxu0 }
  0xeb   :  { %v426_v1 = vadd.f32 %v412_v54, %v134_v51 }
  0xed   :  { %v1599_v61 = vpop.eup %1598  ;;  %v1528_v36 = vmul.f32 -1.442695, %v426_v1 }
  0xee   :  { %v441_v27 = vadd.f32 1.0, %v1599_v61 }
  0xef   :  { %1600 = vpow2.f32 %v1528_v36 }
  0xf0   :  { %1602 = vrcp.f32 %v441_v27  ;;  %vm450_vm2 = vweird.f32 %v441_v27 }
  0xf2   :  { %v415_v63 = vpop.f32.mrf.mxu0 }
  0xf3   :  { %v427_v6 = vadd.f32 %v415_v63, %v137_v62  ;;  %v456_v63 = vand.u32 2147483648, %v441_v27 }
  0xf5   :  { %v1601_v21 = vpop.eup %1600  ;;  %v1529_v22 = vmul.f32 -1.442695, %v427_v6  ;;  %v454_v6 = vand.u32 2147483647, %v441_v27 }
  0xf6   :  { %v1603_v8 = vpop.eup %1602  ;;  %v442_v12 = vadd.f32 1.0, %v1601_v21 }
  0xf7   :  { %1604 = vpow2.f32 %v1529_v22  ;;  %v446_v14 = vmul.f32 %v1603_v8, %v441_v27  ;;  %vm451_vm1 = vweird.f32 %v1603_v8  ;;  %v2043_v22 = vpop.permute.xlu2 %81  ;;  %vm455_vm4 = vcmp.eq.f32.partialorder %v454_v6, 8.507059e+37 }
  0xf8   :  { %1606 = vrcp.f32 %v442_v12  ;;  %vm452_vm3 = vmor %vm450_vm2, %vm451_vm1  ;;  %v469_v35 = vand.u32 2147483647, %v442_v12  ;;  %v471_v26 = vand.u32 2147483648, %v442_v12  ;;  %vm465_vm6 = vweird.f32 %v442_v12 }
  0xf9   :  { %v447_v32 = vsub.f32 1.0, %v446_v14 }
  0xfa   :  { %v417_v1 = vpop.f32.mrf.mxu0  ;;  %vm470_vm8 = vcmp.eq.f32.partialorder %v469_v35, 8.507059e+37 }
  0xfb   :  { %v428_v15 = vadd.f32 %v417_v1, %v139_v28  ;;  %v448_v36 = vmul.f32 %v1603_v8, %v447_v32  ;;  %v457_v28 = vor.u32 1.1754944e-38, %v456_v63 }
  0xfd   :  { %v1605_v51 = vpop.eup %1604  ;;  %v1530_v54 = vmul.f32 -1.442695, %v428_v15  ;;  %v449_v61 = vadd.f32 %v1603_v8, %v448_v36 }
  0xfe   :  { %v1607_v37 = vpop.eup %1606  ;;  %v443_v62 = vadd.f32 1.0, %v1605_v51  ;;  %v142_v51 = vadd.f32 %v1952_v48, %v1956_v50  ;;  %v472_v48 = vor.u32 1.1754944e-38, %v471_v26 }
  0xff   :  { %1608 = vpow2.f32 %v1530_v54  ;;  %v461_v21 = vmul.f32 %v1607_v37, %v442_v12  ;;  %v453_v44 = vsel %vm452_vm3, %v1603_v8, %v449_v61  ;;  %vm466_vm5 = vweird.f32 %v1607_v37 }
 0x100   :  { %1610 = vrcp.f32 %v443_v62  ;;  %v458_v15 = vsel %vm455_vm4, %v457_v28, %v453_v44  ;;  %vm467_vm7 = vmor %vm465_vm6, %vm466_vm5  ;;  %v486_v6 = vand.u32 2147483648, %v443_v62  ;;  %v144_v12 = vadd.f32 %v1961_v55, %v1969_v58 }
 0x101   :  { %v462_v14 = vsub.f32 1.0, %v461_v21  ;;  %v2048_v21 = vpop.permute.xlu2 %86  ;;  %vm480_vm10 = vweird.f32 %v443_v62 }
 0x102   :  { %v420_v23 = vpop.f32.mrf.mxu0 }
 0x103   :  { %v505_v32 = vadd.f32 %v420_v23, %v2043_v22  ;;  %v463_v1 = vmul.f32 %v1607_v37, %v462_v14  ;;  %v484_v14 = vand.u32 2147483647, %v443_v62 }
 0x105   :  { %v1609_v36 = vpop.eup %1608  ;;  %v507_v54 = vmul.f32 %v505_v32, %v458_v15  ;;  %v464_v27 = vadd.f32 %v1607_v37, %v463_v1  ;;  %vm485_vm12 = vcmp.eq.f32.partialorder %v484_v14, 8.507059e+37 }
 0x106   :  { %v1611_v10 = vpop.eup %1610  ;;  %v444_v4 = vadd.f32 1.0, %v1609_v36  ;;  %v487_v36 = vor.u32 1.1754944e-38, %v486_v6 }
 0x107   :  { %v476_v8 = vmul.f32 %v1611_v10, %v443_v62  ;;  %v509_v61 = vadd.f32 %v507_v54, %v142_v51  ;;  %v468_v23 = vsel %vm467_vm7, %v1607_v37, %v464_v27  ;;  %vm481_vm9 = vweird.f32 %v1611_v10 }
 0x108   :  { %1612 = vrcp.f32 %v444_v4  ;;  %v473_v32 = vsel %vm470_vm8, %v472_v48, %v468_v23  ;;  %vm482_vm11 = vmor %vm480_vm10, %vm481_vm9  ;;  %vm495_vm14 = vweird.f32 %v444_v4 }
 0x109   :  { %v477_v63 = vsub.f32 1.0, %v476_v8  ;;  %1614 = vtanh.f32 %v509_v61  ;;  %v501_v61 = vand.u32 2147483648, %v444_v4 }
 0x10a   :  { %v422_v44 = vpop.f32.mrf.mxu0 }
 0x10b   :  { %v478_v50 = vmul.f32 %v1611_v10, %v477_v63  ;;  %v506_v28 = vadd.f32 %v422_v44, %v2048_v21  ;;  %v499_v44 = vand.u32 2147483647, %v444_v4  ;;  %v502_v6 = vor.u32 1.1754944e-38, %v501_v61 }
 0x10d   :  { %v479_v1 = vadd.f32 %v1611_v10, %v478_v50  ;;  %v508_v15 = vmul.f32 %v506_v28, %v473_v32  ;;  %vm500_vm1 = vcmp.eq.f32.partialorder %v499_v44, 8.507059e+37  ;;  %v170_v44 = vadd.f32 %v1936_v40, %v1938_v41 }
 0x10e   :  { %v1613_v37 = vpop.eup %1612 }
 0x10f   :  { %v491_v51 = vmul.f32 %v1613_v37, %v444_v4  ;;  %v483_v35 = vsel %vm482_vm11, %v1611_v10, %v479_v1  ;;  %v510_v26 = vadd.f32 %v508_v15, %v144_v12  ;;  %v1615_v63 = vpop.eup %1614  ;;  %vm496_vm13 = vweird.f32 %v1613_v37  ;;  %v2065_v4 = vpop.f32.mrf.mxu1 }
 0x110   :  { %v488_v54 = vsel %vm485_vm12, %v487_v36, %v483_v35  ;;  %vm497_vm15 = vmor %vm495_vm14, %vm496_vm13 }
 0x111   :  { %v492_v27 = vsub.f32 1.0, %v491_v51  ;;  %v513_v8 = vsub.f32 1.0, %v488_v54  ;;  %v517_v55 = vmul.f32 0.0, %v488_v54  ;;  %1616 = vtanh.f32 %v510_v26 }
 0x113   :  { %v493_v23 = vmul.f32 %v1613_v37, %v492_v27  ;;  %v515_v48 = vmul.f32 %v1615_v63, %v513_v8 }
 0x115   :  { %v494_v62 = vadd.f32 %v1613_v37, %v493_v23  ;;  %v2053_v50 = vadd.f32 %v517_v55, %v515_v48 }
 0x117   :  { %v498_v10 = vsel %vm497_vm15, %v1613_v37, %v494_v62  ;;  %v1617_v32 = vpop.eup %1616 }
 0x118   :  { %v503_v14 = vsel %vm500_vm1, %v502_v6, %v498_v10 }
 0x119   :  { %v514_v28 = vsub.f32 1.0, %v503_v14  ;;  %v518_v1 = vmul.f32 0.0, %v503_v14 }
 0x11b   :  { %v516_v12 = vmul.f32 %v1617_v32, %v514_v28 }
 0x11d   :  { %v2055_v15 = vadd.f32 %v518_v1, %v516_v12 }
 0x11f   :  { %v527_v36 = vpack.c.bf16 %v2055_v15, %v2053_v50 }
 0x121   :  { %535 = vmatpush.bf16.msra.mxu1 %v527_v36 }
 0x124   :  { %1531 = vmatmul.msk.bf16.vlgmr.msra.gmra.mxu1 %vm112_vm0, %v1884_v18 }
 0x134   :  { %1532 = vmatmul.msk.bf16.gmra.mxu1 %vm112_vm0, %v1891_v19 }
 0x144   :  { %1533 = vmatmul.msk.bf16.gmra.mxu1 %vm112_vm0, %v1898_v20 }
 0x1a1   :  { %v537_v37 = vpop.f32.mrf.mxu1 }
 0x1a2   :  { %v552_v51 = vadd.f32 %v537_v37, %v1910_v25 }
 0x1a4   :  { %v1534_v35 = vmul.f32 -1.442695, %v552_v51 }
 0x1a6   :  { %1618 = vpow2.f32 %v1534_v35 }
 0x1a9   :  { %v539_v26 = vpop.f32.mrf.mxu1 }
 0x1aa   :  { %v553_v54 = vadd.f32 %v539_v26, %v1926_v34  ;;  %v172_v34 = vadd.f32 %v1946_v45, %v1954_v49 }
 0x1ac   :  { %v1619_v27 = vpop.eup %1618  ;;  %v1535_v8 = vmul.f32 -1.442695, %v553_v54 }
 0x1ad   :  { %v568_v63 = vadd.f32 1.0, %v1619_v27 }
 0x1ae   :  { %1620 = vpow2.f32 %v1535_v8 }
 0x1af   :  { %1622 = vrcp.f32 %v568_v63  ;;  %v583_v51 = vand.u32 2147483648, %v568_v63  ;;  %vm577_vm3 = vweird.f32 %v568_v63  ;;  %v581_v35 = vand.u32 2147483647, %v568_v63 }
 0x1b1   :  { %v542_v61 = vpop.f32.mrf.mxu1  ;;  %v584_v8 = vor.u32 1.1754944e-38, %v583_v51  ;;  %vm582_vm5 = vcmp.eq.f32.partialorder %v581_v35, 8.507059e+37 }
 0x1b2   :  { %v554_v23 = vadd.f32 %v542_v61, %v170_v44 }
 0x1b4   :  { %v1621_v48 = vpop.eup %1620  ;;  %v1536_v55 = vmul.f32 -1.442695, %v554_v23 }
 0x1b5   :  { %v1623_v62 = vpop.eup %1622  ;;  %v569_v6 = vadd.f32 1.0, %v1621_v48 }
 0x1b6   :  { %1624 = vpow2.f32 %v1536_v55  ;;  %v573_v25 = vmul.f32 %v1623_v62, %v568_v63  ;;  %vm578_vm2 = vweird.f32 %v1623_v62 }
 0x1b7   :  { %1626 = vrcp.f32 %v569_v6  ;;  %vm579_vm4 = vmor %vm577_vm3, %vm578_vm2  ;;  %v598_v63 = vand.u32 2147483648, %v569_v6  ;;  %vm592_vm7 = vweird.f32 %v569_v6 }
 0x1b8   :  { %v574_v10 = vsub.f32 1.0, %v573_v25 }
 0x1b9   :  { %v544_v14 = vpop.f32.mrf.mxu1  ;;  %v599_v51 = vor.u32 1.1754944e-38, %v598_v63 }
 0x1ba   :  { %v555_v28 = vadd.f32 %v544_v14, %v172_v34  ;;  %v575_v32 = vmul.f32 %v1623_v62, %v574_v10  ;;  %v596_v14 = vand.u32 2147483647, %v569_v6 }
 0x1bc   :  { %v1625_v12 = vpop.eup %1624  ;;  %v1537_v1 = vmul.f32 -1.442695, %v555_v28  ;;  %v576_v36 = vadd.f32 %v1623_v62, %v575_v32  ;;  %vm597_vm9 = vcmp.eq.f32.partialorder %v596_v14, 8.507059e+37 }
 0x1bd   :  { %v1627_v40 = vpop.eup %1626  ;;  %v570_v37 = vadd.f32 1.0, %v1625_v12 }
 0x1be   :  { %1628 = vpow2.f32 %v1537_v1  ;;  %v588_v26 = vmul.f32 %v1627_v40, %v569_v6  ;;  %v580_v54 = vsel %vm579_vm4, %v1623_v62, %v576_v36  ;;  %vm593_vm6 = vweird.f32 %v1627_v40 }
 0x1bf   :  { %1630 = vrcp.f32 %v570_v37  ;;  %v585_v23 = vsel %vm582_vm5, %v584_v8, %v580_v54  ;;  %vm594_vm8 = vmor %vm592_vm7, %vm593_vm6  ;;  %v613_v1 = vand.u32 2147483648, %v570_v37  ;;  %vm607_vm11 = vweird.f32 %v570_v37 }
 0x1c0   :  { %v589_v27 = vsub.f32 1.0, %v588_v26  ;;  %v611_v26 = vand.u32 2147483647, %v570_v37 }
 0x1c1   :  { %v547_v45 = vpop.f32.mrf.mxu1  ;;  %v614_v6 = vor.u32 1.1754944e-38, %v613_v1 }
 0x1c2   :  { %v632_v44 = vadd.f32 %v547_v45, %v2043_v22  ;;  %v590_v61 = vmul.f32 %v1627_v40, %v589_v27  ;;  %vm612_vm13 = vcmp.eq.f32.partialorder %v611_v26, 8.507059e+37 }
 0x1c4   :  { %v1629_v48 = vpop.eup %1628  ;;  %v634_v55 = vmul.f32 %v632_v44, %v585_v23  ;;  %v591_v25 = vadd.f32 %v1627_v40, %v590_v61 }
 0x1c5   :  { %v1631_v34 = vpop.eup %1630  ;;  %v571_v10 = vadd.f32 1.0, %v1629_v48 }
 0x1c6   :  { %v603_v28 = vmul.f32 %v1631_v34, %v570_v37  ;;  %v636_v32 = vadd.f32 %v634_v55, %v1959_v52  ;;  %v595_v12 = vsel %vm594_vm8, %v1627_v40, %v591_v25  ;;  %vm608_vm10 = vweird.f32 %v1631_v34 }
 0x1c7   :  { %1632 = vrcp.f32 %v571_v10  ;;  %v600_v27 = vsel %vm597_vm9, %v599_v51, %v595_v12  ;;  %vm609_vm12 = vmor %vm607_vm11, %vm608_vm10  ;;  %v626_v14 = vand.u32 2147483647, %v571_v10  ;;  %v628_v63 = vand.u32 2147483648, %v571_v10 }
 0x1c8   :  { %v604_v62 = vsub.f32 1.0, %v603_v28  ;;  %1634 = vtanh.f32 %v636_v32  ;;  %vm622_vm15 = vweird.f32 %v571_v10 }
 0x1c9   :  { %v549_v36 = vpop.f32.mrf.mxu1  ;;  %vm627_vm2 = vcmp.eq.f32.partialorder %v626_v14, 8.507059e+37 }
 0x1ca   :  { %v605_v35 = vmul.f32 %v1631_v34, %v604_v62  ;;  %v633_v54 = vadd.f32 %v549_v36, %v2048_v21 }
 0x1cc   :  { %v606_v45 = vadd.f32 %v1631_v34, %v605_v35  ;;  %v635_v8 = vmul.f32 %v633_v54, %v600_v27 }
 0x1cd   :  { %v1633_v52 = vpop.eup %1632 }
 0x1ce   :  { %v618_v44 = vmul.f32 %v1633_v52, %v571_v10  ;;  %v610_v40 = vsel %vm609_vm12, %v1631_v34, %v606_v45  ;;  %v637_v61 = vadd.f32 %v635_v8, %v1972_v60  ;;  %v1635_v25 = vpop.eup %1634  ;;  %vm623_vm14 = vweird.f32 %v1633_v52  ;;  %v2091_v10 = vpop.f32.mrf.mxu2 }
 0x1cf   :  { %v615_v23 = vsel %vm612_vm13, %v614_v6, %v610_v40  ;;  %vm624_vm1 = vmor %vm622_vm15, %vm623_vm14  ;;  %v629_v34 = vor.u32 1.1754944e-38, %v628_v63 }
 0x1d0   :  { %v619_v48 = vsub.f32 1.0, %v618_v44  ;;  %v640_v55 = vsub.f32 1.0, %v615_v23  ;;  %v644_v37 = vmul.f32 %v615_v23, %v2053_v50  ;;  %1636 = vtanh.f32 %v637_v61 }
 0x1d2   :  { %v620_v28 = vmul.f32 %v1633_v52, %v619_v48  ;;  %v642_v32 = vmul.f32 %v1635_v25, %v640_v55  ;;  %v203_v48 = vadd.f32 %v1940_v42, %v1938_v41 }
 0x1d4   :  { %v621_v62 = vadd.f32 %v1633_v52, %v620_v28  ;;  %v2078_v12 = vadd.f32 %v644_v37, %v642_v32 }
 0x1d6   :  { %v625_v60 = vsel %vm624_vm1, %v1633_v52, %v621_v62  ;;  %v1637_v51 = vpop.eup %1636 }
 0x1d7   :  { %v630_v1 = vsel %vm627_vm2, %v629_v34, %v625_v60 }
 0x1d8   :  { %v641_v36 = vsub.f32 1.0, %v630_v1  ;;  %v645_v26 = vmul.f32 %v630_v1, %v2055_v15 }
 0x1da   :  { %v643_v35 = vmul.f32 %v1637_v51, %v641_v36 }
 0x1dc   :  { %v2081_v54 = vadd.f32 %v645_v26, %v643_v35 }
 0x1de   :  { %v654_v27 = vpack.c.bf16 %v2081_v54, %v2078_v12 }
 0x1e0   :  { %662 = vmatpush.bf16.msra.mxu2 %v654_v27 }
 0x1e3   :  { %1538 = vmatmul.msk.bf16.vlgmr.msra.gmra.mxu2 %vm112_vm0, %v1884_v18 }
 0x1f3   :  { %1539 = vmatmul.msk.bf16.gmra.mxu2 %vm112_vm0, %v1891_v19 }
 0x203   :  { %1540 = vmatmul.msk.bf16.gmra.mxu2 %vm112_vm0, %v1898_v20 }
 0x266   :  { %v664_v45 = vpop.f32.mrf.mxu2 }
 0x267   :  { %v679_v8 = vadd.f32 %v664_v45, %v1915_v29 }
 0x269   :  { %v1541_v52 = vmul.f32 -1.442695, %v679_v8 }
 0x26b   :  { %1638 = vpow2.f32 %v1541_v52 }
 0x26e   :  { %v666_v6 = vpop.f32.mrf.mxu2 }
 0x26f   :  { %v680_v44 = vadd.f32 %v666_v6, %v1931_v38  ;;  %v205_v38 = vadd.f32 %v1948_v46, %v1954_v49 }
 0x271   :  { %v1639_v40 = vpop.eup %1638  ;;  %v1542_v61 = vmul.f32 -1.442695, %v680_v44 }
 0x272   :  { %v695_v23 = vadd.f32 1.0, %v1639_v40 }
 0x273   :  { %1640 = vpow2.f32 %v1542_v61 }
 0x274   :  { %1642 = vrcp.f32 %v695_v23  ;;  %v710_v26 = vand.u32 2147483648, %v695_v23  ;;  %vm704_vm4 = vweird.f32 %v695_v23  ;;  %v708_v27 = vand.u32 2147483647, %v695_v23 }
 0x276   :  { %v669_v55 = vpop.f32.mrf.mxu2  ;;  %v711_v6 = vor.u32 1.1754944e-38, %v710_v26  ;;  %vm709_vm6 = vcmp.eq.f32.partialorder %v708_v27, 8.507059e+37 }
 0x277   :  { %v681_v25 = vadd.f32 %v669_v55, %v203_v48 }
 0x279   :  { %v1641_v14 = vpop.eup %1640  ;;  %v1543_v63 = vmul.f32 -1.442695, %v681_v25 }
 0x27a   :  { %v1643_v28 = vpop.eup %1642  ;;  %v696_v32 = vadd.f32 1.0, %v1641_v14 }
 0x27b   :  { %1644 = vpow2.f32 %v1543_v63  ;;  %v700_v29 = vmul.f32 %v1643_v28, %v695_v23  ;;  %vm705_vm3 = vweird.f32 %v1643_v28 }
 0x27c   :  { %1646 = vrcp.f32 %v696_v32  ;;  %vm706_vm5 = vmor %vm704_vm4, %vm705_vm3  ;;  %v725_v23 = vand.u32 2147483648, %v696_v32  ;;  %vm719_vm8 = vweird.f32 %v696_v32 }
 0x27d   :  { %v701_v37 = vsub.f32 1.0, %v700_v29  ;;  %v723_v29 = vand.u32 2147483647, %v696_v32 }
 0x27e   :  { %v671_v62 = vpop.f32.mrf.mxu2 }
 0x27f   :  { %v682_v34 = vadd.f32 %v671_v62, %v205_v38  ;;  %v702_v60 = vmul.f32 %v1643_v28, %v701_v37  ;;  %vm724_vm10 = vcmp.eq.f32.partialorder %v723_v29, 8.507059e+37 }
 0x281   :  { %v1645_v1 = vpop.eup %1644  ;;  %v1544_v36 = vmul.f32 -1.442695, %v682_v34  ;;  %v703_v51 = vadd.f32 %v1643_v28, %v702_v60 }
 0x282   :  { %v1647_v42 = vpop.eup %1646  ;;  %v697_v35 = vadd.f32 1.0, %v1645_v1  ;;  %v726_v1 = vor.u32 1.1754944e-38, %v725_v23 }
 0x283   :  { %1648 = vpow2.f32 %v1544_v36  ;;  %v715_v45 = vmul.f32 %v1647_v42, %v696_v32  ;;  %v707_v8 = vsel %vm706_vm5, %v1643_v28, %v703_v51  ;;  %vm720_vm7 = vweird.f32 %v1647_v42 }
 0x284   :  { %1650 = vrcp.f32 %v697_v35  ;;  %v712_v61 = vsel %vm709_vm6, %v711_v6, %v707_v8  ;;  %vm721_vm9 = vmor %vm719_vm8, %vm720_vm7  ;;  %v740_v34 = vand.u32 2147483648, %v697_v35  ;;  %v738_v51 = vand.u32 2147483647, %v697_v35 }
 0x285   :  { %v716_v52 = vsub.f32 1.0, %v715_v45  ;;  %vm734_vm12 = vweird.f32 %v697_v35 }
 0x286   :  { %v674_v46 = vpop.f32.mrf.mxu2  ;;  %v741_v32 = vor.u32 1.1754944e-38, %v740_v34  ;;  %vm739_vm14 = vcmp.eq.f32.partialorder %v738_v51, 8.507059e+37 }
 0x287   :  { %v759_v44 = vadd.f32 %v674_v46, %v2043_v22  ;;  %v717_v40 = vmul.f32 %v1647_v42, %v716_v52 }
 0x289   :  { %v1649_v48 = vpop.eup %1648  ;;  %v761_v55 = vmul.f32 %v759_v44, %v712_v61  ;;  %v718_v25 = vadd.f32 %v1647_v42, %v717_v40 }
 0x28a   :  { %v1651_v14 = vpop.eup %1650  ;;  %v698_v63 = vadd.f32 1.0, %v1649_v48 }
 0x28b   :  { %v730_v38 = vmul.f32 %v1651_v14, %v697_v35  ;;  %v763_v37 = vadd.f32 %v761_v55, %v1964_v56  ;;  %v722_v62 = vsel %vm721_vm9, %v1647_v42, %v718_v25  ;;  %vm735_vm11 = vweird.f32 %v1651_v14 }
 0x28c   :  { %1652 = vrcp.f32 %v698_v63  ;;  %v727_v27 = vsel %vm724_vm10, %v726_v1, %v722_v62  ;;  %vm736_vm13 = vmor %vm734_vm12, %vm735_vm11  ;;  %v753_v48 = vand.u32 2147483647, %v698_v63  ;;  %v755_v55 = vand.u32 2147483648, %v698_v63 }
 0x28d   :  { %v731_v28 = vsub.f32 1.0, %v730_v38  ;;  %1654 = vtanh.f32 %v763_v37  ;;  %vm749_vm1 = vweird.f32 %v698_v63 }
 0x28e   :  { %v676_v60 = vpop.f32.mrf.mxu2  ;;  %vm754_vm3 = vcmp.eq.f32.partialorder %v753_v48, 8.507059e+37 }
 0x28f   :  { %v732_v36 = vmul.f32 %v1651_v14, %v731_v28  ;;  %v760_v26 = vadd.f32 %v676_v60, %v2048_v21 }
 0x291   :  { %v733_v45 = vadd.f32 %v1651_v14, %v732_v36  ;;  %v762_v8 = vmul.f32 %v760_v26, %v727_v27 }
 0x292   :  { %v1653_v56 = vpop.eup %1652 }
 0x293   :  { %v745_v52 = vmul.f32 %v1653_v56, %v698_v63  ;;  %v737_v42 = vsel %vm736_vm13, %v1651_v14, %v733_v45  ;;  %v764_v46 = vadd.f32 %v762_v8, %v1975_v0  ;;  %v1655_v61 = vpop.eup %1654  ;;  %vm750_vm15 = vweird.f32 %v1653_v56  ;;  %v2117_v63 = vpop.f32.mrf.mxu3 }
 0x294   :  { %v742_v6 = vsel %vm739_vm14, %v741_v32, %v737_v42  ;;  %vm751_vm2 = vmor %vm749_vm1, %vm750_vm15  ;;  %v756_v14 = vor.u32 1.1754944e-38, %v755_v55 }
 0x295   :  { %v746_v44 = vsub.f32 1.0, %v745_v52  ;;  %v767_v40 = vsub.f32 1.0, %v742_v6  ;;  %v771_v35 = vmul.f32 %v742_v6, %v2078_v12  ;;  %1656 = vtanh.f32 %v764_v46 }
 0x297   :  { %v747_v25 = vmul.f32 %v1653_v56, %v746_v44  ;;  %v769_v29 = vmul.f32 %v1655_v61, %v767_v40 }
 0x299   :  { %v748_v23 = vadd.f32 %v1653_v56, %v747_v25  ;;  %v2104_v38 = vadd.f32 %v771_v35, %v769_v29 }
 0x29b   :  { %v752_v0 = vsel %vm751_vm2, %v1653_v56, %v748_v23  ;;  %v1657_v62 = vpop.eup %1656 }
 0x29c   :  { %v757_v37 = vsel %vm754_vm3, %v756_v14, %v752_v0 }
 0x29d   :  { %v768_v28 = vsub.f32 1.0, %v757_v37  ;;  %v772_v60 = vmul.f32 %v757_v37, %v2081_v54 }
 0x29f   :  { %v770_v34 = vmul.f32 %v1657_v62, %v768_v28 }
 0x2a1   :  { %v2107_v1 = vadd.f32 %v772_v60, %v770_v34 }
 0x2a3   :  { %v781_v36 = vpack.c.bf16 %v2107_v1, %v2104_v38 }
 0x2a5   :  { %789 = vmatpush.bf16.msra.mxu3 %v781_v36 }
 0x2a8   :  { %1545 = vmatmul.msk.bf16.vlgmr.msra.gmra.mxu3 %vm112_vm0, %v1884_v18  ;;  %v236_v18 = vadd.f32 %v1942_v43, %v1938_v41 }
 0x2b8   :  { %1546 = vmatmul.msk.bf16.gmra.mxu3 %vm112_vm0, %v1891_v19 }
 0x2c8   :  { %1547 = vmatmul.msk.bf16.gmra.mxu3 %vm112_vm0, %v1898_v20 }
 0x32b   :  { %v791_v51 = vpop.f32.mrf.mxu3 }
 0x32c   :  { %v806_v26 = vadd.f32 %v791_v51, %v1918_v30 }
 0x32e   :  { %v1548_v27 = vmul.f32 -1.442695, %v806_v26 }
 0x330   :  { %1658 = vpow2.f32 %v1548_v27 }
 0x333   :  { %v793_v45 = vpop.f32.mrf.mxu3 }
 0x334   :  { %v807_v8 = vadd.f32 %v793_v45, %v1934_v39  ;;  %v238_v39 = vadd.f32 %v1950_v47, %v1954_v49 }
 0x336   :  { %v1659_v56 = vpop.eup %1658  ;;  %v1549_v32 = vmul.f32 -1.442695, %v807_v8 }
 0x337   :  { %v822_v52 = vadd.f32 1.0, %v1659_v56 }
 0x338   :  { %1660 = vpow2.f32 %v1549_v32 }
 0x339   :  { %1662 = vrcp.f32 %v822_v52  ;;  %v837_v14 = vand.u32 2147483648, %v822_v52  ;;  %vm831_vm5 = vweird.f32 %v822_v52  ;;  %v835_v0 = vand.u32 2147483647, %v822_v52 }
 0x33b   :  { %v796_v19 = vpop.f32.mrf.mxu3  ;;  %v838_v34 = vor.u32 1.1754944e-38, %v837_v14  ;;  %vm836_vm7 = vcmp.eq.f32.partialorder %v835_v0, 8.507059e+37 }
 0x33c   :  { %v808_v20 = vadd.f32 %v796_v19, %v236_v18 }
 0x33e   :  { %v1661_v42 = vpop.eup %1660  ;;  %v1550_v46 = vmul.f32 -1.442695, %v808_v20 }
 0x33f   :  { %v1663_v6 = vpop.eup %1662  ;;  %v823_v44 = vadd.f32 1.0, %v1661_v42 }
 0x340   :  { %1664 = vpow2.f32 %v1550_v46  ;;  %v827_v30 = vmul.f32 %v1663_v6, %v822_v52  ;;  %vm832_vm4 = vweird.f32 %v1663_v6 }
 0x341   :  { %1666 = vrcp.f32 %v823_v44  ;;  %vm833_vm6 = vmor %vm831_vm5, %vm832_vm4  ;;  %v850_v32 = vand.u32 2147483647, %v823_v44  ;;  %v852_v52 = vand.u32 2147483648, %v823_v44  ;;  %vm846_vm9 = vweird.f32 %v823_v44 }
 0x342   :  { %v828_v40 = vsub.f32 1.0, %v827_v30 }
 0x343   :  { %v798_v61 = vpop.f32.mrf.mxu3  ;;  %vm851_vm11 = vcmp.eq.f32.partialorder %v850_v32, 8.507059e+37  ;;  %v853_v30 = vor.u32 1.1754944e-38, %v852_v52 }
 0x344   :  { %v809_v48 = vadd.f32 %v798_v61, %v238_v39  ;;  %v829_v55 = vmul.f32 %v1663_v6, %v828_v40 }
 0x346   :  { %v1665_v25 = vpop.eup %1664  ;;  %v1551_v29 = vmul.f32 -1.442695, %v809_v48  ;;  %v830_v35 = vadd.f32 %v1663_v6, %v829_v55 }
 0x347   :  { %v1667_v43 = vpop.eup %1666  ;;  %v824_v23 = vadd.f32 1.0, %v1665_v25 }
 0x348   :  { %1668 = vpow2.f32 %v1551_v29  ;;  %v842_v37 = vmul.f32 %v1667_v43, %v823_v44  ;;  %v834_v28 = vsel %vm833_vm6, %v1663_v6, %v830_v35  ;;  %vm847_vm8 = vweird.f32 %v1667_v43 }
 0x349   :  { %1670 = vrcp.f32 %v824_v23  ;;  %v839_v51 = vsel %vm836_vm7, %v838_v34, %v834_v28  ;;  %vm848_vm10 = vmor %vm846_vm9, %vm847_vm8  ;;  %v867_v46 = vand.u32 2147483648, %v824_v23  ;;  %v865_v40 = vand.u32 2147483647, %v824_v23 }
 0x34a   :  { %v843_v62 = vsub.f32 1.0, %v842_v37  ;;  %vm861_vm13 = vweird.f32 %v824_v23 }
 0x34b   :  { %v801_v47 = vpop.f32.mrf.mxu3  ;;  %v868_v44 = vor.u32 1.1754944e-38, %v867_v46  ;;  %vm866_vm15 = vcmp.eq.f32.partialorder %v865_v40, 8.507059e+37 }
 0x34c   :  { %v886_v60 = vadd.f32 %v801_v47, %v2043_v22  ;;  %v844_v36 = vmul.f32 %v1667_v43, %v843_v62 }
 0x34e   :  { %v1669_v26 = vpop.eup %1668  ;;  %v888_v27 = vmul.f32 %v886_v60, %v839_v51  ;;  %v845_v45 = vadd.f32 %v1667_v43, %v844_v36 }
 0x34f   :  { %v1671_v8 = vpop.eup %1670  ;;  %v825_v56 = vadd.f32 1.0, %v1669_v26 }
 0x350   :  { %v857_v18 = vmul.f32 %v1671_v8, %v824_v23  ;;  %v890_v19 = vadd.f32 %v888_v27, %v1967_v57  ;;  %v849_v42 = vsel %vm848_vm10, %v1667_v43, %v845_v45  ;;  %vm862_vm12 = vweird.f32 %v1671_v8 }
 0x351   :  { %1672 = vrcp.f32 %v825_v56  ;;  %v854_v48 = vsel %vm851_vm11, %v853_v30, %v849_v42  ;;  %vm863_vm14 = vmor %vm861_vm13, %vm862_vm12  ;;  %v880_v62 = vand.u32 2147483647, %v825_v56  ;;  %v882_v47 = vand.u32 2147483648, %v825_v56  ;;  %v2154_v42 = vld [vmem:[%s2413_s4 + $0x10] sm:$0xff] }
 0x352   :  { %v858_v20 = vsub.f32 1.0, %v857_v18  ;;  %1674 = vtanh.f32 %v890_v19  ;;  %vm876_vm2 = vweird.f32 %v825_v56 }
 0x353   :  { %v803_v6 = vpop.f32.mrf.mxu3  ;;  %v883_v26 = vor.u32 1.1754944e-38, %v882_v47  ;;  %vm881_vm4 = vcmp.eq.f32.partialorder %v880_v62, 8.507059e+37 }
 0x354   :  { %v859_v39 = vmul.f32 %v1671_v8, %v858_v20  ;;  %v887_v61 = vadd.f32 %v803_v6, %v2048_v21  ;;  %v2147_v20 = vld [vmem:[%s2413_s4 + $0x8] sm:$0xff] }
 0x356   :  { %v860_v55 = vadd.f32 %v1671_v8, %v859_v39  ;;  %v889_v25 = vmul.f32 %v887_v61, %v854_v48 }
 0x357   :  { %v1673_v57 = vpop.eup %1672 }
 0x358   :  { %v872_v29 = vmul.f32 %v1673_v57, %v825_v56  ;;  %v864_v35 = vsel %vm863_vm14, %v1671_v8, %v860_v55  ;;  %v891_v43 = vadd.f32 %v889_v25, %v1978_v2  ;;  %v1675_v28 = vpop.eup %1674  ;;  %vm877_vm1 = vweird.f32 %v1673_v57  ;;  %v2140_v56 = vld [vmem:[%s2413_s4] sm:$0xff] }
 0x359   :  { %v869_v14 = vsel %vm866_vm15, %v868_v44, %v864_v35  ;;  %vm878_vm3 = vmor %vm876_vm2, %vm877_vm1  ;;  %v269_v25 = vadd.f32 %v1998_v16, %v1938_v41 }
 0x35a   :  { %v873_v0 = vsub.f32 1.0, %v872_v29  ;;  %v894_v37 = vsub.f32 1.0, %v869_v14  ;;  %v898_v23 = vmul.f32 %v869_v14, %v2104_v38  ;;  %1676 = vtanh.f32 %v891_v43 }
 0x35c   :  { %v874_v34 = vmul.f32 %v1673_v57, %v873_v0  ;;  %v896_v60 = vmul.f32 %v1675_v28, %v894_v37 }
 0x35e   :  { %v875_v36 = vadd.f32 %v1673_v57, %v874_v34  ;;  %v2130_v51 = vadd.f32 %v898_v23, %v896_v60 }
 0x360   :  { %v879_v2 = vsel %vm878_vm3, %v1673_v57, %v875_v36  ;;  %v1677_v8 = vpop.eup %1676 }
 0x361   :  { %v884_v27 = vsel %vm881_vm4, %v883_v26, %v879_v2 }
 0x362   :  { %v895_v45 = vsub.f32 1.0, %v884_v27  ;;  %v899_v52 = vmul.f32 %v884_v27, %v2107_v1 }
 0x364   :  { %v897_v32 = vmul.f32 %v1677_v8, %v895_v45 }
 0x366   :  { %v2133_v18 = vadd.f32 %v899_v52, %v897_v32 }
 0x368   :  { %v908_v19 = vpack.c.bf16 %v2133_v18, %v2130_v51 }
 0x36a   :  { %916 = vmatpush.bf16.msrb.mxu0 %v908_v19 }
 0x36d   :  { %1552 = vmatmul.msk.bf16.vlgmr.msrb.gmra.mxu0 %vm112_vm0, %v2140_v56 }
 0x37d   :  { %1553 = vmatmul.msk.bf16.gmra.mxu0 %vm112_vm0, %v2147_v20 }
 0x38d   :  { %1554 = vmatmul.msk.bf16.gmra.mxu0 %vm112_vm0, %v2154_v42 }
 0x3ea   :  { %v918_v46 = vpop.f32.mrf.mxu0 }
 0x3eb   :  { %v933_v6 = vadd.f32 %v918_v46, %v1981_v3 }
 0x3ed   :  { %v1555_v30 = vmul.f32 -1.442695, %v933_v6 }
 0x3ef   :  { %1678 = vpow2.f32 %v1555_v30 }
 0x3f2   :  { %v920_v39 = vpop.f32.mrf.mxu0 }
 0x3f3   :  { %v934_v40 = vadd.f32 %v920_v39, %v1993_v11  ;;  %v271_v11 = vadd.f32 %v2012_v31, %v1954_v49 }
 0x3f5   :  { %v1679_v61 = vpop.eup %1678  ;;  %v1556_v48 = vmul.f32 -1.442695, %v934_v40 }
 0x3f6   :  { %v949_v55 = vadd.f32 1.0, %v1679_v61 }
 0x3f7   :  { %1680 = vpow2.f32 %v1556_v48 }
 0x3f8   :  { %1682 = vrcp.f32 %v949_v55  ;;  %v964_v36 = vand.u32 2147483648, %v949_v55  ;;  %vm958_vm6 = vweird.f32 %v949_v55  ;;  %v962_v26 = vand.u32 2147483647, %v949_v55 }
 0x3fa   :  { %v923_v57 = vpop.f32.mrf.mxu0  ;;  %v965_v8 = vor.u32 1.1754944e-38, %v964_v36  ;;  %vm963_vm8 = vcmp.eq.f32.partialorder %v962_v26, 8.507059e+37 }
 0x3fb   :  { %v935_v44 = vadd.f32 %v923_v57, %v269_v25 }
 0x3fd   :  { %v1681_v29 = vpop.eup %1680  ;;  %v1557_v35 = vmul.f32 -1.442695, %v935_v44 }
 0x3fe   :  { %v1683_v43 = vpop.eup %1682  ;;  %v950_v14 = vadd.f32 1.0, %v1681_v29 }
 0x3ff   :  { %1684 = vpow2.f32 %v1557_v35  ;;  %v954_v3 = vmul.f32 %v1683_v43, %v949_v55  ;;  %vm959_vm5 = vweird.f32 %v1683_v43 }
 0x400   :  { %1686 = vrcp.f32 %v950_v14  ;;  %vm960_vm7 = vmor %vm958_vm6, %vm959_vm5  ;;  %v977_v61 = vand.u32 2147483647, %v950_v14  ;;  %v979_v48 = vand.u32 2147483648, %v950_v14  ;;  %vm973_vm10 = vweird.f32 %v950_v14 }
 0x401   :  { %v955_v0 = vsub.f32 1.0, %v954_v3 }
 0x402   :  { %v925_v37 = vpop.f32.mrf.mxu0  ;;  %vm978_vm12 = vcmp.eq.f32.partialorder %v977_v61, 8.507059e+37 }
 0x403   :  { %v936_v28 = vadd.f32 %v925_v37, %v271_v11  ;;  %v956_v62 = vmul.f32 %v1683_v43, %v955_v0 }
 0x405   :  { %v1685_v47 = vpop.eup %1684  ;;  %v1558_v34 = vmul.f32 -1.442695, %v936_v28  ;;  %v957_v60 = vadd.f32 %v1683_v43, %v956_v62 }
 0x406   :  { %v1687_v16 = vpop.eup %1686  ;;  %v951_v23 = vadd.f32 1.0, %v1685_v47 }
 0x407   :  { %1688 = vpow2.f32 %v1558_v34  ;;  %v969_v2 = vmul.f32 %v1687_v16, %v950_v14  ;;  %v961_v27 = vsel %vm960_vm7, %v1683_v43, %v957_v60  ;;  %vm974_vm9 = vweird.f32 %v1687_v16 }
 0x408   :  { %1690 = vrcp.f32 %v951_v23  ;;  %v966_v19 = vsel %vm963_vm8, %v965_v8, %v961_v27  ;;  %vm975_vm11 = vmor %vm973_vm10, %vm974_vm9  ;;  %v994_v29 = vand.u32 2147483648, %v951_v23  ;;  %v980_v43 = vor.u32 1.1754944e-38, %v979_v48 }
 0x409   :  { %v970_v45 = vsub.f32 1.0, %v969_v2  ;;  %v992_v11 = vand.u32 2147483647, %v951_v23  ;;  %vm988_vm14 = vweird.f32 %v951_v23 }
 0x40a   :  { %v928_v31 = vpop.f32.mrf.mxu0  ;;  %v995_v14 = vor.u32 1.1754944e-38, %v994_v29 }
 0x40b   :  { %v1013_v32 = vadd.f32 %v928_v31, %v2043_v22  ;;  %v971_v52 = vmul.f32 %v1687_v16, %v970_v45  ;;  %vm993_vm1 = vcmp.eq.f32.partialorder %v992_v11, 8.507059e+37  ;;  %v302_v11 = vadd.f32 %v2006_v24, %v1938_v41 }
 0x40d   :  { %v1689_v46 = vpop.eup %1688  ;;  %v1015_v6 = vmul.f32 %v1013_v32, %v966_v19  ;;  %v972_v30 = vadd.f32 %v1687_v16, %v971_v52 }
 0x40e   :  { %v1691_v39 = vpop.eup %1690  ;;  %v952_v40 = vadd.f32 1.0, %v1689_v46 }
 0x40f   :  { %v984_v55 = vmul.f32 %v1691_v39, %v951_v23  ;;  %v1017_v25 = vadd.f32 %v1015_v6, %v2021_v53  ;;  %v976_v44 = vsel %vm975_vm11, %v1687_v16, %v972_v30  ;;  %vm989_vm13 = vweird.f32 %v1691_v39 }
 0x410   :  { %1692 = vrcp.f32 %v952_v40  ;;  %v981_v37 = vsel %vm978_vm12, %v980_v43, %v976_v44  ;;  %vm990_vm15 = vmor %vm988_vm14, %vm989_vm13  ;;  %v1007_v27 = vand.u32 2147483647, %v952_v40  ;;  %v1009_v45 = vand.u32 2147483648, %v952_v40 }
 0x411   :  { %v985_v57 = vsub.f32 1.0, %v984_v55  ;;  %1694 = vtanh.f32 %v1017_v25  ;;  %vm1003_vm3 = vweird.f32 %v952_v40 }
 0x412   :  { %v930_v35 = vpop.f32.mrf.mxu0  ;;  %v1010_v19 = vor.u32 1.1754944e-38, %v1009_v45  ;;  %vm1008_vm5 = vcmp.eq.f32.partialorder %v1007_v27, 8.507059e+37 }
 0x413   :  { %v986_v3 = vmul.f32 %v1691_v39, %v985_v57  ;;  %v1014_v0 = vadd.f32 %v930_v35, %v2048_v21 }
 0x415   :  { %v987_v28 = vadd.f32 %v1691_v39, %v986_v3  ;;  %v1016_v62 = vmul.f32 %v1014_v0, %v981_v37 }
 0x416   :  { %v1693_v53 = vpop.eup %1692 }
 0x417   :  { %v999_v47 = vmul.f32 %v1693_v53, %v952_v40  ;;  %v991_v34 = vsel %vm990_vm15, %v1691_v39, %v987_v28  ;;  %v1018_v60 = vadd.f32 %v1016_v62, %v2033_v7  ;;  %v1695_v2 = vpop.eup %1694  ;;  %vm1004_vm2 = vweird.f32 %v1693_v53 }
 0x418   :  { %v996_v16 = vsel %vm993_vm1, %v995_v14, %v991_v34  ;;  %vm1005_vm4 = vmor %vm1003_vm3, %vm1004_vm2 }
 0x419   :  { %v1000_v36 = vsub.f32 1.0, %v999_v47  ;;  %v1021_v26 = vsub.f32 1.0, %v996_v16  ;;  %v1025_v23 = vmul.f32 %v996_v16, %v2130_v51  ;;  %1696 = vtanh.f32 %v1018_v60 }
 0x41b   :  { %v1001_v31 = vmul.f32 %v1693_v53, %v1000_v36  ;;  %v1023_v8 = vmul.f32 %v1695_v2, %v1021_v26 }
 0x41d   :  { %v1002_v32 = vadd.f32 %v1693_v53, %v1001_v31  ;;  %v2169_v52 = vadd.f32 %v1025_v23, %v1023_v8 }
 0x41f   :  { %v1006_v7 = vsel %vm1005_vm4, %v1693_v53, %v1002_v32  ;;  %v1697_v30 = vpop.eup %1696 }
 0x420   :  { %v1011_v46 = vsel %vm1008_vm5, %v1010_v19, %v1006_v7 }
 0x421   :  { %v1022_v6 = vsub.f32 1.0, %v1011_v46  ;;  %v1026_v61 = vmul.f32 %v1011_v46, %v2133_v18 }
 0x423   :  { %v1024_v39 = vmul.f32 %v1697_v30, %v1022_v6 }
 0x425   :  { %v2172_v48 = vadd.f32 %v1026_v61, %v1024_v39 }
 0x427   :  { %v1035_v55 = vpack.c.bf16 %v2172_v48, %v2169_v52 }
 0x429   :  { %1043 = vmatpush.bf16.msrb.mxu1 %v1035_v55 }
 0x42c   :  { %1559 = vmatmul.msk.bf16.vlgmr.msrb.gmra.mxu1 %vm112_vm0, %v2140_v56 }
 0x43c   :  { %1560 = vmatmul.msk.bf16.gmra.mxu1 %vm112_vm0, %v2147_v20 }
 0x44c   :  { %1561 = vmatmul.msk.bf16.gmra.mxu1 %vm112_vm0, %v2154_v42 }
 0x4a9   :  { %v1045_v40 = vpop.f32.mrf.mxu1 }
 0x4aa   :  { %v1060_v25 = vadd.f32 %v1045_v40, %v1984_v5 }
 0x4ac   :  { %v1562_v57 = vmul.f32 -1.442695, %v1060_v25 }
 0x4ae   :  { %1698 = vpow2.f32 %v1562_v57 }
 0x4b1   :  { %v1047_v44 = vpop.f32.mrf.mxu1 }
 0x4b2   :  { %v1061_v29 = vadd.f32 %v1047_v44, %v1996_v13  ;;  %v304_v13 = vadd.f32 %v2014_v33, %v1954_v49 }
 0x4b4   :  { %v1699_v35 = vpop.eup %1698  ;;  %v1563_v43 = vmul.f32 -1.442695, %v1061_v29 }
 0x4b5   :  { %v1076_v3 = vadd.f32 1.0, %v1699_v35 }
 0x4b6   :  { %1700 = vpow2.f32 %v1563_v43 }
 0x4b7   :  { %1702 = vrcp.f32 %v1076_v3  ;;  %v1091_v45 = vand.u32 2147483648, %v1076_v3  ;;  %vm1085_vm7 = vweird.f32 %v1076_v3  ;;  %v1089_v31 = vand.u32 2147483647, %v1076_v3 }
 0x4b9   :  { %v1050_v0 = vpop.f32.mrf.mxu1  ;;  %v1092_v19 = vor.u32 1.1754944e-38, %v1091_v45  ;;  %vm1090_vm9 = vcmp.eq.f32.partialorder %v1089_v31, 8.507059e+37 }
 0x4ba   :  { %v1062_v37 = vadd.f32 %v1050_v0, %v302_v11 }
 0x4bc   :  { %v1701_v28 = vpop.eup %1700  ;;  %v1564_v62 = vmul.f32 -1.442695, %v1062_v37 }
 0x4bd   :  { %v1703_v53 = vpop.eup %1702  ;;  %v1077_v14 = vadd.f32 1.0, %v1701_v28 }
 0x4be   :  { %1704 = vpow2.f32 %v1564_v62  ;;  %v1081_v5 = vmul.f32 %v1703_v53, %v1076_v3  ;;  %vm1086_vm6 = vweird.f32 %v1703_v53 }
 0x4bf   :  { %1706 = vrcp.f32 %v1077_v14  ;;  %vm1087_vm8 = vmor %vm1085_vm7, %vm1086_vm6  ;;  %v1104_v25 = vand.u32 2147483647, %v1077_v14  ;;  %v1106_v57 = vand.u32 2147483648, %v1077_v14  ;;  %vm1100_vm11 = vweird.f32 %v1077_v14 }
 0x4c0   :  { %v1082_v47 = vsub.f32 1.0, %v1081_v5  ;;  %v309_v5 = vadd.f32 %v2065_v4, %v1969_v58 }
 0x4c1   :  { %v1052_v34 = vpop.f32.mrf.mxu1  ;;  %vm1105_vm13 = vcmp.eq.f32.partialorder %v1104_v25, 8.507059e+37  ;;  %v1107_v0 = vor.u32 1.1754944e-38, %v1106_v57 }
 0x4c2   :  { %v1063_v60 = vadd.f32 %v1052_v34, %v304_v13  ;;  %v1083_v16 = vmul.f32 %v1703_v53, %v1082_v47 }
 0x4c4   :  { %v1705_v36 = vpop.eup %1704  ;;  %v1565_v26 = vmul.f32 -1.442695, %v1063_v60  ;;  %v1084_v2 = vadd.f32 %v1703_v53, %v1083_v16 }
 0x4c5   :  { %v1707_v24 = vpop.eup %1706  ;;  %v1078_v27 = vadd.f32 1.0, %v1705_v36 }
 0x4c6   :  { %1708 = vpow2.f32 %v1565_v26  ;;  %v1096_v8 = vmul.f32 %v1707_v24, %v1077_v14  ;;  %v1088_v23 = vsel %vm1087_vm8, %v1703_v53, %v1084_v2  ;;  %vm1101_vm10 = vweird.f32 %v1707_v24 }
 0x4c7   :  { %1710 = vrcp.f32 %v1078_v27  ;;  %v1093_v6 = vsel %vm1090_vm9, %v1092_v19, %v1088_v23  ;;  %vm1102_vm12 = vmor %vm1100_vm11, %vm1101_vm10  ;;  %v1121_v3 = vand.u32 2147483648, %v1078_v27  ;;  %v1119_v28 = vand.u32 2147483647, %v1078_v27 }
 0x4c8   :  { %v1097_v32 = vsub.f32 1.0, %v1096_v8  ;;  %vm1115_vm15 = vweird.f32 %v1078_v27 }
 0x4c9   :  { %v1055_v33 = vpop.f32.mrf.mxu1  ;;  %v1122_v47 = vor.u32 1.1754944e-38, %v1121_v3  ;;  %vm1120_vm2 = vcmp.eq.f32.partialorder %v1119_v28, 8.507059e+37 }
 0x4ca   :  { %v1140_v7 = vadd.f32 %v1055_v33, %v2043_v22  ;;  %v1098_v46 = vmul.f32 %v1707_v24, %v1097_v32 }
 0x4cc   :  { %v1709_v30 = vpop.eup %1708  ;;  %v1142_v39 = vmul.f32 %v1140_v7, %v1093_v6  ;;  %v1099_v61 = vadd.f32 %v1707_v24, %v1098_v46 }
 0x4cd   :  { %v1711_v55 = vpop.eup %1710  ;;  %v1079_v40 = vadd.f32 1.0, %v1709_v30 }
 0x4ce   :  { %v1111_v44 = vmul.f32 %v1711_v55, %v1078_v27  ;;  %v1144_v29 = vadd.f32 %v1142_v39, %v2024_v59  ;;  %v1103_v43 = vsel %vm1102_vm12, %v1707_v24, %v1099_v61  ;;  %vm1116_vm14 = vweird.f32 %v1711_v55 }
 0x4cf   :  { %1712 = vrcp.f32 %v1079_v40  ;;  %v1108_v53 = vsel %vm1105_vm13, %v1107_v0, %v1103_v43  ;;  %vm1117_vm1 = vmor %vm1115_vm15, %vm1116_vm14  ;;  %v1134_v45 = vand.u32 2147483647, %v1079_v40  ;;  %v1136_v31 = vand.u32 2147483648, %v1079_v40 }
 0x4d0   :  { %v1112_v35 = vsub.f32 1.0, %v1111_v44  ;;  %1714 = vtanh.f32 %v1144_v29  ;;  %vm1130_vm4 = vweird.f32 %v1079_v40 }
 0x4d1   :  { %v1057_v11 = vpop.f32.mrf.mxu1  ;;  %v1137_v33 = vor.u32 1.1754944e-38, %v1136_v31  ;;  %vm1135_vm6 = vcmp.eq.f32.partialorder %v1134_v45, 8.507059e+37 }
 0x4d2   :  { %v1113_v37 = vmul.f32 %v1711_v55, %v1112_v35  ;;  %v1141_v62 = vadd.f32 %v1057_v11, %v2048_v21  ;;  %v2428_v11 = vld [vmem:[#allocation4_spill] sm:$0xff] }
 0x4d3   :  { %v335_v0 = vadd.f32 %v2428_v11, %v1938_v41 }
 0x4d4   :  { %v1114_v59 = vadd.f32 %v1711_v55, %v1113_v37  ;;  %v1143_v14 = vmul.f32 %v1141_v62, %v1108_v53 }
 0x4d5   :  { %v1713_v13 = vpop.eup %1712 }
 0x4d6   :  { %v1126_v34 = vmul.f32 %v1713_v13, %v1079_v40  ;;  %v1118_v60 = vsel %vm1117_vm1, %v1711_v55, %v1114_v59  ;;  %v1145_v16 = vadd.f32 %v1143_v14, %v309_v5  ;;  %v1715_v24 = vpop.eup %1714  ;;  %vm1131_vm3 = vweird.f32 %v1713_v13  ;;  %v2429_v14 = vld [vmem:[#allocation6_spill] sm:$0xff] }
 0x4d7   :  { %v1123_v36 = vsel %vm1120_vm2, %v1122_v47, %v1118_v60  ;;  %vm1132_vm5 = vmor %vm1130_vm4, %vm1131_vm3 }
 0x4d8   :  { %v1127_v26 = vsub.f32 1.0, %v1126_v34  ;;  %v1148_v2 = vsub.f32 1.0, %v1123_v36  ;;  %v1152_v4 = vmul.f32 %v1123_v36, %v2169_v52  ;;  %1716 = vtanh.f32 %v1145_v16 }
 0x4da   :  { %v1128_v8 = vmul.f32 %v1713_v13, %v1127_v26  ;;  %v1150_v23 = vmul.f32 %v1715_v24, %v1148_v2 }
 0x4dc   :  { %v1129_v27 = vadd.f32 %v1713_v13, %v1128_v8  ;;  %v2194_v32 = vadd.f32 %v1152_v4, %v1150_v23 }
 0x4de   :  { %v1133_v19 = vsel %vm1132_vm5, %v1713_v13, %v1129_v27  ;;  %v1717_v6 = vpop.eup %1716 }
 0x4df   :  { %v1138_v7 = vsel %vm1135_vm6, %v1137_v33, %v1133_v19 }
 0x4e0   :  { %v1149_v46 = vsub.f32 1.0, %v1138_v7  ;;  %v1153_v39 = vmul.f32 %v1138_v7, %v2172_v48 }
 0x4e2   :  { %v1151_v30 = vmul.f32 %v1717_v6, %v1149_v46 }
 0x4e4   :  { %v2197_v61 = vadd.f32 %v1153_v39, %v1151_v30 }
 0x4e6   :  { %v1162_v55 = vpack.c.bf16 %v2197_v61, %v2194_v32 }
 0x4e8   :  { %1170 = vmatpush.bf16.msrb.mxu2 %v1162_v55 }
 0x4eb   :  { %1566 = vmatmul.msk.bf16.vlgmr.msrb.gmra.mxu2 %vm112_vm0, %v2140_v56 }
 0x4fb   :  { %1567 = vmatmul.msk.bf16.gmra.mxu2 %vm112_vm0, %v2147_v20 }
 0x50b   :  { %1568 = vmatmul.msk.bf16.gmra.mxu2 %vm112_vm0, %v2154_v42 }
 0x56e   :  { %v1172_v40 = vpop.f32.mrf.mxu2 }
 0x56f   :  { %v1187_v25 = vadd.f32 %v1172_v40, %v1987_v9 }
 0x571   :  { %v1569_v57 = vmul.f32 -1.442695, %v1187_v25 }
 0x573   :  { %1718 = vpow2.f32 %v1569_v57 }
 0x576   :  { %v1174_v44 = vpop.f32.mrf.mxu2 }
 0x577   :  { %v1188_v29 = vadd.f32 %v1174_v44, %v2001_v17  ;;  %v337_v17 = vadd.f32 %v2429_v14, %v1954_v49 }
 0x579   :  { %v1719_v35 = vpop.eup %1718  ;;  %v1570_v43 = vmul.f32 -1.442695, %v1188_v29  ;;  %v2430_v29 = vld [vmem:[#allocation8_spill] sm:$0xff] }
 0x57a   :  { %v1203_v3 = vadd.f32 1.0, %v1719_v35 }
 0x57b   :  { %1720 = vpow2.f32 %v1570_v43 }
 0x57c   :  { %1722 = vrcp.f32 %v1203_v3  ;;  %v1218_v45 = vand.u32 2147483648, %v1203_v3  ;;  %vm1212_vm8 = vweird.f32 %v1203_v3  ;;  %v1216_v31 = vand.u32 2147483647, %v1203_v3 }
 0x57e   :  { %v1177_v37 = vpop.f32.mrf.mxu2  ;;  %v1219_v33 = vor.u32 1.1754944e-38, %v1218_v45  ;;  %vm1217_vm10 = vcmp.eq.f32.partialorder %v1216_v31, 8.507059e+37 }
 0x57f   :  { %v1189_v28 = vadd.f32 %v1177_v37, %v335_v0 }
 0x581   :  { %v1721_v62 = vpop.eup %1720  ;;  %v1571_v53 = vmul.f32 -1.442695, %v1189_v28 }
 0x582   :  { %v1723_v5 = vpop.eup %1722  ;;  %v1204_v59 = vadd.f32 1.0, %v1721_v62 }
 0x583   :  { %1724 = vpow2.f32 %v1571_v53  ;;  %v1208_v9 = vmul.f32 %v1723_v5, %v1203_v3  ;;  %vm1213_vm7 = vweird.f32 %v1723_v5 }
 0x584   :  { %1726 = vrcp.f32 %v1204_v59  ;;  %vm1214_vm9 = vmor %vm1212_vm8, %vm1213_vm7  ;;  %v1231_v25 = vand.u32 2147483647, %v1204_v59  ;;  %v1233_v57 = vand.u32 2147483648, %v1204_v59  ;;  %vm1227_vm12 = vweird.f32 %v1204_v59 }
 0x585   :  { %v1209_v13 = vsub.f32 1.0, %v1208_v9  ;;  %v342_v9 = vadd.f32 %v2091_v10, %v1969_v58 }
 0x586   :  { %v1179_v47 = vpop.f32.mrf.mxu2  ;;  %vm1232_vm14 = vcmp.eq.f32.partialorder %v1231_v25, 8.507059e+37  ;;  %v1234_v37 = vor.u32 1.1754944e-38, %v1233_v57  ;;  %v2431_v25 = vld [vmem:[#allocation2_spill] sm:$0xff] }
 0x587   :  { %v1190_v34 = vadd.f32 %v1179_v47, %v337_v17  ;;  %v1210_v60 = vmul.f32 %v1723_v5, %v1209_v13 }
 0x589   :  { %v1725_v16 = vpop.eup %1724  ;;  %v1572_v36 = vmul.f32 -1.442695, %v1190_v34  ;;  %v1211_v26 = vadd.f32 %v1723_v5, %v1210_v60 }
 0x58a   :  { %v1727_v2 = vpop.eup %1726  ;;  %v1205_v24 = vadd.f32 1.0, %v1725_v16 }
 0x58b   :  { %1728 = vpow2.f32 %v1572_v36  ;;  %v1223_v8 = vmul.f32 %v1727_v2, %v1204_v59  ;;  %v1215_v23 = vsel %vm1214_vm9, %v1723_v5, %v1211_v26  ;;  %vm1228_vm11 = vweird.f32 %v1727_v2 }
 0x58c   :  { %1730 = vrcp.f32 %v1205_v24  ;;  %v1220_v46 = vsel %vm1217_vm10, %v1219_v33, %v1215_v23  ;;  %vm1229_vm13 = vmor %vm1227_vm12, %vm1228_vm11  ;;  %v1248_v11 = vand.u32 2147483648, %v1205_v24  ;;  %v1246_v62 = vand.u32 2147483647, %v1205_v24 }
 0x58d   :  { %v1224_v4 = vsub.f32 1.0, %v1223_v8  ;;  %vm1242_vm1 = vweird.f32 %v1205_v24 }
 0x58e   :  { %v1182_v27 = vpop.f32.mrf.mxu2  ;;  %v1249_v13 = vor.u32 1.1754944e-38, %v1248_v11  ;;  %vm1247_vm3 = vcmp.eq.f32.partialorder %v1246_v62, 8.507059e+37 }
 0x58f   :  { %v1267_v19 = vadd.f32 %v1182_v27, %v2043_v22  ;;  %v1225_v7 = vmul.f32 %v1727_v2, %v1224_v4 }
 0x591   :  { %v1729_v6 = vpop.eup %1728  ;;  %v1269_v30 = vmul.f32 %v1267_v19, %v1220_v46  ;;  %v1226_v39 = vadd.f32 %v1727_v2, %v1225_v7 }
 0x592   :  { %v1731_v55 = vpop.eup %1730  ;;  %v1206_v40 = vadd.f32 1.0, %v1729_v6 }
 0x593   :  { %v1238_v44 = vmul.f32 %v1731_v55, %v1205_v24  ;;  %v1271_v35 = vadd.f32 %v1269_v30, %v2430_v29  ;;  %v1230_v3 = vsel %vm1229_vm13, %v1727_v2, %v1226_v39  ;;  %vm1243_vm15 = vweird.f32 %v1731_v55 }
 0x594   :  { %1732 = vrcp.f32 %v1206_v40  ;;  %v1235_v5 = vsel %vm1232_vm14, %v1234_v37, %v1230_v3  ;;  %vm1244_vm2 = vmor %vm1242_vm1, %vm1243_vm15  ;;  %v1261_v45 = vand.u32 2147483647, %v1206_v40  ;;  %v1263_v31 = vand.u32 2147483648, %v1206_v40 }
 0x595   :  { %v1239_v43 = vsub.f32 1.0, %v1238_v44  ;;  %1734 = vtanh.f32 %v1271_v35  ;;  %vm1257_vm5 = vweird.f32 %v1206_v40  ;;  %v2432_v35 = vld [vmem:[#allocation3_spill] sm:$0xff] }
 0x596   :  { %v1184_v0 = vpop.f32.mrf.mxu2  ;;  %v1264_v27 = vor.u32 1.1754944e-38, %v1263_v31  ;;  %vm1262_vm7 = vcmp.eq.f32.partialorder %v1261_v45, 8.507059e+37 }
 0x597   :  { %v1240_v28 = vmul.f32 %v1731_v55, %v1239_v43  ;;  %v1268_v53 = vadd.f32 %v1184_v0, %v2048_v21 }
 0x599   :  { %v1241_v14 = vadd.f32 %v1731_v55, %v1240_v28  ;;  %v1270_v59 = vmul.f32 %v1268_v53, %v1235_v5 }
 0x59a   :  { %v1733_v17 = vpop.eup %1732 }
 0x59b   :  { %v1253_v47 = vmul.f32 %v1733_v17, %v1206_v40  ;;  %v1245_v34 = vsel %vm1244_vm2, %v1731_v55, %v1241_v14  ;;  %v1272_v60 = vadd.f32 %v1270_v59, %v342_v9  ;;  %v1735_v2 = vpop.eup %1734  ;;  %vm1258_vm4 = vweird.f32 %v1733_v17 }
 0x59c   :  { %v1250_v16 = vsel %vm1247_vm3, %v1249_v13, %v1245_v34  ;;  %vm1259_vm6 = vmor %vm1257_vm5, %vm1258_vm4  ;;  %v2434_v9 = vmov 0  }
 0x59d   :  { %v1254_v36 = vsub.f32 1.0, %v1253_v47  ;;  %v1275_v26 = vsub.f32 1.0, %v1250_v16  ;;  %v1279_v10 = vmul.f32 %v1250_v16, %v2194_v32  ;;  %1736 = vtanh.f32 %v1272_v60 }
 0x59f   :  { %v1255_v8 = vmul.f32 %v1733_v17, %v1254_v36  ;;  %v1277_v23 = vmul.f32 %v1735_v2, %v1275_v26 }
 0x5a1   :  { %v1256_v24 = vadd.f32 %v1733_v17, %v1255_v8  ;;  %v2219_v4 = vadd.f32 %v1279_v10, %v1277_v23 }
 0x5a3   :  { %v1260_v33 = vsel %vm1259_vm6, %v1733_v17, %v1256_v24  ;;  %v1737_v46 = vpop.eup %1736 }
 0x5a4   :  { %v1265_v19 = vsel %vm1262_vm7, %v1264_v27, %v1260_v33 }
 0x5a5   :  { %v1276_v7 = vsub.f32 1.0, %v1265_v19  ;;  %v1280_v30 = vmul.f32 %v1265_v19, %v2197_v61 }
 0x5a7   :  { %v1278_v6 = vmul.f32 %v1737_v46, %v1276_v7 }
 0x5a9   :  { %v2222_v39 = vadd.f32 %v1280_v30, %v1278_v6 }
 0x5ab   :  { %v1289_v55 = vpack.c.bf16 %v2222_v39, %v2219_v4 }
 0x5ad   :  { %1297 = vmatpush.bf16.msrb.mxu3 %v1289_v55 }
 0x5b0   :  { %1573 = vmatmul.msk.bf16.vlgmr.msrb.gmra.mxu3 %vm112_vm0, %v2140_v56  ;;  %v2237_v56 = vld [vmem:[%s2415_s1] sm:$0x1] }
 0x5b1   :  { %vm648_vm8 = vcmp.eq.s32.totalorder %v2237_v56, 1  ;;  %vm775_vm9 = vcmp.eq.s32.totalorder %v2237_v56, 2  ;;  %vm902_vm1 = vcmp.eq.s32.totalorder %v2237_v56, 3  ;;  %vm1029_vm2 = vcmp.eq.s32.totalorder %v2237_v56, 4 }
 0x5b2   :  { %v649_v17 = vsel %vm648_vm8, 1, %v2434_v9  ;;  %v776_v60 = vsel %vm775_vm9, 1, %v2434_v9  ;;  %vm1156_vm5 = vcmp.eq.s32.totalorder %v2237_v56, 5  ;;  %vm1283_vm7 = vcmp.eq.s32.totalorder %v2237_v56, 6 }
 0x5b3   :  { %v650_v36 = vperm.slane %v649_v17, 0  ;;  %v777_v31 = vperm.slane %v776_v60, 0  ;;  %vm1410_vm9 = vcmp.eq.s32.totalorder %v2237_v56, 7 }
 0x5b5   :  { %vm2258_vm12 = vcmp.eq.s32.totalorder %v650_v36, 1  ;;  %vm2269_vm14 = vcmp.eq.s32.totalorder %v777_v31, 1 }
 0x5c0   :  { %1574 = vmatmul.msk.bf16.gmra.mxu3 %vm112_vm0, %v2147_v20  ;;  %v2433_v20 = vld [vmem:[#allocation5_spill] sm:$0xff] }
 0x5d0   :  { %1575 = vmatmul.msk.bf16.gmra.mxu3 %vm112_vm0, %v2154_v42  ;;  %v368_v42 = vadd.f32 %v2433_v20, %v1938_v41  ;;  %vm521_vm0 = vcmp.eq.s32.totalorder %v2237_v56, 0  ;;  %v2435_v41 = vld [vmem:[#allocation7_spill] sm:$0xff] }
 0x5d1   :  { %v522_v14 = vsel %vm521_vm0, 1, %v2434_v9  ;;  %v370_v47 = vadd.f32 %v2435_v41, %v1954_v49  ;;  %v1157_v41 = vsel %vm1156_vm5, 1, %v2434_v9 }
 0x5d2   :  { %v523_v34 = vperm.slane %v522_v14, 0 }
 0x5d4   :  { %vm2252_vm10 = vcmp.eq.s32.totalorder %v523_v34, 1  ;;  %v1284_v34 = vsel %vm1283_vm7, 1, %v2434_v9 }
 0x5d5   :  { %v525_v6 = vsel %vm2252_vm10, %v2053_v50, 0.0 }
 0x633   :  { %v1299_v40 = vpop.f32.mrf.mxu3 }
 0x634   :  { %v1314_v57 = vadd.f32 %v1299_v40, %v2431_v25  ;;  %v40_v40 = vld [vmem:[%s2416_s2] sm:$0x1] }
 0x635   :  { %vm1416_vm4 = vcmp.gt.s32.totalorder %v40_v40, 1 }
 0x636   :  { %v1576_v44 = vmul.f32 -1.442695, %v1314_v57  ;;  %v375_v57 = vadd.f32 %v2117_v63, %v1969_v58  ;;  %v1030_v58 = vsel %vm1029_vm2, 1, %v2434_v9  ;;  %v1417_v14 = vsel %vm1416_vm4, %v40_v40, 1 }
 0x638   :  { %1738 = vpow2.f32 %v1576_v44  ;;  %v2290_v44 = vsel %vm2258_vm12, %v2078_v12, %v525_v6 }
 0x63b   :  { %v1301_v29 = vpop.f32.mrf.mxu3 }
 0x63c   :  { %v1315_v43 = vadd.f32 %v1301_v29, %v2432_v35 }
 0x63e   :  { %v1739_v3 = vpop.eup %1738  ;;  %v1577_v11 = vmul.f32 -1.442695, %v1315_v43  ;;  %v779_v43 = vsel %vm2269_vm14, %v2104_v38, %v2290_v44 }
 0x63f   :  { %v1330_v0 = vadd.f32 1.0, %v1739_v3 }
 0x640   :  { %1740 = vpow2.f32 %v1577_v11 }
 0x641   :  { %1742 = vrcp.f32 %v1330_v0  ;;  %v1345_v19 = vand.u32 2147483648, %v1330_v0  ;;  %vm1339_vm13 = vweird.f32 %v1330_v0  ;;  %v1343_v7 = vand.u32 2147483647, %v1330_v0 }
 0x643   :  { %v1304_v37 = vpop.f32.mrf.mxu3  ;;  %v1346_v35 = vor.u32 1.1754944e-38, %v1345_v19  ;;  %vm1344_vm3 = vcmp.eq.f32.partialorder %v1343_v7, 8.507059e+37  ;;  %v1411_v19 = vsel %vm1410_vm9, 1, %v2434_v9 }
 0x644   :  { %v1316_v28 = vadd.f32 %v1304_v37, %v368_v42 }
 0x646   :  { %v1741_v62 = vpop.eup %1740  ;;  %v1578_v53 = vmul.f32 -1.442695, %v1316_v28 }
 0x647   :  { %v1743_v5 = vpop.eup %1742  ;;  %v2245_v59 = vadd.f32 1.0, %v1741_v62 }
 0x648   :  { %1744 = vpow2.f32 %v1578_v53  ;;  %v1335_v13 = vmul.f32 %v1743_v5, %v1330_v0  ;;  %vm1340_vm11 = vweird.f32 %v1743_v5  ;;  %v903_v0 = vsel %vm902_vm1, 1, %v2434_v9  ;;  %v2444_v53 = vld [vmem:[#allocation9_spill] sm:$0xff] }
 0x649   :  { %1746 = vrcp.f32 %v2245_v59  ;;  %vm2274_vm15 = vmor %vm1339_vm13, %vm1340_vm11  ;;  %v1358_v37 = vand.u32 2147483647, %v2245_v59  ;;  %v1360_v28 = vand.u32 2147483648, %v2245_v59  ;;  %vm1354_vm0 = vweird.f32 %v2245_v59 }
 0x64a   :  { %v1336_v16 = vsub.f32 1.0, %v1335_v13  ;;  %v904_v17 = vperm.slane %v903_v0, 0  ;;  %v1031_v13 = vperm.slane %v1030_v58, 0  ;;  %vm1418_vm11 = vcmp.lt.s32.totalorder %v2237_v56, %v1417_v14 }
 0x64b   :  { %v1306_v26 = vpop.f32.mrf.mxu3  ;;  %vm1359_vm13 = vcmp.eq.f32.partialorder %v1358_v37, 8.507059e+37  ;;  %v1419_v40 = vsel %vm1418_vm11, 1, %v2434_v9 }
 0x64c   :  { %v1317_v2 = vadd.f32 %v1306_v26, %v370_v47  ;;  %v1337_v45 = vmul.f32 %v1743_v5, %v1336_v16  ;;  %v1361_v26 = vor.u32 1.1754944e-38, %v1360_v28  ;;  %vm2326_vm1 = vcmp.eq.s32.totalorder %v904_v17, 1 }
 0x64d   :  { %v906_v44 = vsel %vm2326_vm1, %v2130_v51, %v779_v43  ;;  %v1420_v58 = vperm.slane %v1419_v40, 0 }
 0x64e   :  { %v1745_v8 = vpop.eup %1744  ;;  %v1579_v10 = vmul.f32 -1.442695, %v1317_v2  ;;  %v1338_v24 = vadd.f32 %v1743_v5, %v1337_v45 }
 0x64f   :  { %v2256_v27 = vpop.eup %1746  ;;  %v2262_v33 = vadd.f32 1.0, %v1745_v8  ;;  %vm2367_vm11 = vcmp.eq.s32.totalorder %v1420_v58, 1 }
 0x650   :  { %1748 = vpow2.f32 %v1579_v10  ;;  %v1350_v46 = vmul.f32 %v2256_v27, %v2245_v59  ;;  %v1342_v50 = vsel %vm2274_vm15, %v1743_v5, %v1338_v24  ;;  %vm1355_vm6 = vweird.f32 %v2256_v27 }
 0x651   :  { %1750 = vrcp.f32 %v2262_v33  ;;  %v1347_v63 = vsel %vm1344_vm3, %v1346_v35, %v1342_v50  ;;  %vm2313_vm8 = vmor %vm1354_vm0, %vm1355_vm6  ;;  %v1375_v59 = vand.u32 2147483648, %v2262_v33  ;;  %v1373_v45 = vand.u32 2147483647, %v2262_v33 }
 0x652   :  { %v1351_v25 = vsub.f32 1.0, %v1350_v46  ;;  %v1158_v10 = vperm.slane %v1157_v41, 0  ;;  %vm1369_vm2 = vweird.f32 %v2262_v33  ;;  %vm2334_vm3 = vcmp.eq.s32.totalorder %v1031_v13, 1 }
 0x653   :  { %v1309_v29 = vpop.f32.mrf.mxu3  ;;  %v1376_v55 = vor.u32 1.1754944e-38, %v1375_v59  ;;  %vm1374_vm5 = vcmp.eq.f32.partialorder %v1373_v45, 8.507059e+37  ;;  %v1412_v35 = vperm.slane %v1411_v19, 0  ;;  %v1033_v9 = vsel %vm2334_vm3, %v2169_v52, %v906_v44 }
 0x654   :  { %v1394_v3 = vadd.f32 %v1309_v29, %v2043_v22  ;;  %v1352_v11 = vmul.f32 %v2256_v27, %v1351_v25  ;;  %vm2345_vm6 = vcmp.eq.s32.totalorder %v1158_v10, 1 }
 0x656   :  { %v1749_v12 = vpop.eup %1748  ;;  %v1396_v20 = vmul.f32 %v1394_v3, %v1347_v63  ;;  %v1353_v42 = vadd.f32 %v2256_v27, %v1352_v11 }
 0x657   :  { %v1751_v38 = vpop.eup %1750  ;;  %v2304_v22 = vadd.f32 1.0, %v1749_v12 }
 0x658   :  { %v1365_v62 = vmul.f32 %v1751_v38, %v2262_v33  ;;  %v1398_v5 = vadd.f32 %v1396_v20, %v2444_v53  ;;  %v1357_v16 = vsel %vm2313_vm8, %v2256_v27, %v1353_v42  ;;  %vm1370_vm15 = vweird.f32 %v1751_v38 }
 0x659   :  { %1752 = vrcp.f32 %v2304_v22  ;;  %v1362_v24 = vsel %vm1359_vm13, %v1361_v26, %v1357_v16  ;;  %vm1371_vm4 = vmor %vm1369_vm2, %vm1370_vm15  ;;  %v1388_v51 = vand.u32 2147483647, %v2304_v22  ;;  %v1390_v43 = vand.u32 2147483648, %v2304_v22 }
 0x65a   :  { %v1366_v60 = vsub.f32 1.0, %v1365_v62  ;;  %1754 = vtanh.f32 %v1398_v5  ;;  %v1160_v42 = vsel %vm2345_vm6, %v2194_v32, %v1033_v9  ;;  %vm2362_vm8 = vcmp.eq.s32.totalorder %v1412_v35, 1 }
 0x65b   :  { %v1311_v36 = vpop.f32.mrf.mxu3  ;;  %vm1384_vm9 = vweird.f32 %v2304_v22  ;;  %v1391_v53 = vor.u32 1.1754944e-38, %v1390_v43  ;;  %vm1389_vm15 = vcmp.eq.f32.partialorder %v1388_v51, 8.507059e+37 }
 0x65c   :  { %v1367_v2 = vmul.f32 %v1751_v38, %v1366_v60  ;;  %v1395_v31 = vadd.f32 %v1311_v36, %v2048_v21  ;;  %v1285_v21 = vperm.slane %v1284_v34, 0 }
 0x65e   :  { %v1368_v27 = vadd.f32 %v1751_v38, %v1367_v2  ;;  %v1397_v7 = vmul.f32 %v1395_v31, %v1362_v24  ;;  %vm2352_vm7 = vcmp.eq.s32.totalorder %v1285_v21, 1 }
 0x65f   :  { %v1753_v46 = vpop.eup %1752  ;;  %v1287_v62 = vsel %vm2352_vm7, %v2219_v4, %v1160_v42 }
 0x660   :  { %v1380_v33 = vmul.f32 %v1753_v46, %v2304_v22  ;;  %v1372_v50 = vsel %vm1371_vm4, %v1751_v38, %v1368_v27  ;;  %v1399_v25 = vadd.f32 %v1397_v7, %v375_v57  ;;  %v1755_v56 = vpop.eup %1754  ;;  %vm1385_vm0 = vweird.f32 %v1753_v46 }
 0x661   :  { %v1377_v29 = vsel %vm1374_vm5, %v1376_v55, %v1372_v50  ;;  %vm1386_vm13 = vmor %vm1384_vm9, %vm1385_vm0  ;;  %v526_v22 = vsel %vm2252_vm10, %v2055_v15, 0.0 }
 0x662   :  { %v1381_v11 = vsub.f32 1.0, %v1380_v33  ;;  %v1402_v0 = vsub.f32 1.0, %v1377_v29  ;;  %v1406_v20 = vmul.f32 %v1377_v29, %v2219_v4  ;;  %1756 = vtanh.f32 %v1399_v25 }
 0x663   :  { %v653_v13 = vsel %vm2258_vm12, %v2081_v54, %v526_v22 }
 0x664   :  { %v1382_v63 = vmul.f32 %v1753_v46, %v1381_v11  ;;  %v1404_v12 = vmul.f32 %v1755_v56, %v1402_v0  ;;  %v780_v47 = vsel %vm2269_vm14, %v2107_v1, %v653_v13 }
 0x665   :  { %v907_v15 = vsel %vm2326_vm1, %v2133_v18, %v780_v47 }
 0x666   :  { %v1383_v52 = vadd.f32 %v1753_v46, %v1382_v63  ;;  %v1408_v37 = vadd.f32 %v1406_v20, %v1404_v12  ;;  %v1034_v54 = vsel %vm2334_vm3, %v2172_v48, %v907_v15 }
 0x667   :  { %v1161_v49 = vsel %vm2345_vm6, %v2197_v61, %v1034_v54 }
 0x668   :  { %v1414_v32 = vsel %vm2362_vm8, %v1408_v37, %v1287_v62  ;;  %v1387_v5 = vsel %vm1386_vm13, %v1753_v46, %v1383_v52  ;;  %v1757_v41 = vpop.eup %1756  ;;  %v1288_v1 = vsel %vm2352_vm7, %v2222_v39, %v1161_v49 }
 0x669   :  { %v1422_v14 = vsel %vm2367_vm11, %v1414_v32, 0.0  ;;  %v1392_v17 = vsel %vm1389_vm15, %v1391_v53, %v1387_v5 }
 0x66a   :  { %1424 = vst [vmem:[%s2417_s7] sm:$0xff] %v1422_v14  ;;  %v1403_v4 = vsub.f32 1.0, %v1392_v17  ;;  %v1407_v34 = vmul.f32 %v1392_v17, %v2222_v39 }
 0x66c   :  { %v1405_v23 = vmul.f32 %v1757_v41, %v1403_v4 }
 0x66e   :  { %v1409_v60 = vadd.f32 %v1407_v34, %v1405_v23 }
 0x670   :  { %v1415_v30 = vsel %vm2362_vm8, %v1409_v60, %v1288_v1 }
 0x671   :  { %v1423_v18 = vsel %vm2367_vm11, %v1415_v30, 0.0 }
 0x672   :  { %1425 = vst [vmem:[%s2417_s7 + $0x8] sm:$0xff] %v1423_v18 }

</bundles_post_ra>
